<compile_context>
chip_gen: v7x
topology: tpu7x:2x2x1
jax: 0.10.0
libtpu: 0.0.40
codegen_flags: <defaults>
</compile_context>

<pallas_src>
import functools

import jax
import jax.numpy as jnp
import numpy as np
from jax.experimental import pallas as pl
from jax.experimental.pallas import tpu as pltpu


def _round_up(x, m):
    return (x + m - 1) // m * m


def _pad_last(a, target):
    pad = target - a.shape[-1]
    if pad == 0:
        return a
    widths = [(0, 0)] * (a.ndim - 1) + [(0, pad)]
    return jnp.pad(a, widths)


def _pad2(a, rows, cols):
    pr, pc = rows - a.shape[0], cols - a.shape[1]
    if pr == 0 and pc == 0:
        return a
    return jnp.pad(a, ((0, pr), (0, pc)))


def _vmem_budget_bytes():
    """Per-generation VMEM budget: ~48 MiB on v7x, ~96 MiB on v5e/v6e."""
    cap = 64 * 2 ** 20                       # conservative physical fallback (v7x)
    try:
        cap = int(getattr(pltpu.get_tpu_info(), "vmem_capacity_bytes", cap))
    except Exception:
        pass
    return int(min(0.75 * cap, 104 * 2 ** 20))


def _exp_dtype_for_device():
    """bf16 exp on chips with a bf16 EUP (v6e/v7x); f32 on v5e and older."""
    try:
        kind = jax.devices()[0].device_kind.lower()
    except Exception:
        return jnp.float32
    if any(t in kind for t in ("v2", "v3", "v4", "v5")):
        return jnp.float32
    return jnp.bfloat16


def _footprint_bytes(b, L, cin_p, ckv_p, cv_p, cout_p):
    """Conservative per-grid-step VMEM estimate (double-buffered I/O + intermediates)."""
    per_elem = L * (
        2 * 2 * cin_p          # bf16 input block, double-buffered
        + 2 * 2 * cout_p       # bf16 output block, double-buffered
        + 2 * cin_p            # flattened x2 copy (bf16)
        + 6 * ckv_p            # fused qv projection: f32 result + bf16 copy
        + 8 * L + 8            # sim (f32) + p (<= f32) + row max / denom
        + 4 * cv_p             # ctx (f32)
        + 4 * cout_p           # out2 (f32)
    )
    w_bytes = 2 * (2 * (cin_p * ckv_p + cv_p * cout_p) + 4 * (ckv_p + cout_p))
    return b * per_elem + w_bytes


def _choose_block_batch(N, L, cin_p, ckv_p, cv_p, cout_p, scale, budget):
    divisors = [d for d in range(1, N + 1) if N % d == 0]
    fitting = [d for d in divisors
               if _footprint_bytes(d, L, cin_p, ckv_p, cv_p, cout_p) <= budget]
    if not fitting:
        # TODO(synk): even a single pyramid block exceeds the budget (very large
        # L) -> needs the flash-style online-softmax inner loop; run with b=1.
        fitting = [1]
    # Keep >= 4 grid steps for DMA/compute overlap and v7x megacore when possible.
    enough_steps = [d for d in fitting if (N // d) * scale * scale >= 4]
    candidates = enough_steps or fitting
    # Prefer MXU M-alignment (b*L multiple of 256 for v6e/v7x) when available.
    aligned = [d for d in candidates if (d * L) % 256 == 0]
    return max(aligned) if aligned else max(candidates)


def _pyramid_attn_kernel(x_ref, wqkv_ref, bqkv_ref, ww_ref, bw_ref, o_ref, *,
                         ck_p, exp_dtype):
    """block_batch pyramid blocks of local self-attention per grid step."""
    b, sh, sw, cin = x_ref.shape
    L = sh * sw
    cout = o_ref.shape[-1]

    # (b, sh, sw, Cin) -> (b*L, Cin); layout-free since sw % 8 == 0, cin % 128 == 0.
    x2 = x_ref[...].reshape(b * L, cin)

    # Fused shared-q/k + v projection: a single 256+-lane-wide MXU matmul
    # instead of two half-width ones.  Inference BN and key_channels**-0.25 are
    # pre-folded into the q/k columns on the host.  bf16 MXU, f32 accumulation.
    qv = (jnp.dot(x2, wqkv_ref[...], preferred_element_type=jnp.float32)
          + bqkv_ref[...]).astype(jnp.bfloat16)
    q = qv[:, :ck_p].reshape(b, L, ck_p)                       # q == k
    v = qv[:, ck_p:].reshape(b, L, -1)

    # sim = key_channels^-0.5 * q @ k^T (scale pre-folded), batched last-dim
    # contraction -> no k.T materialization.
    sim = jnp.einsum("blk,bmk->blm", q, q, preferred_element_type=jnp.float32)

    # Softmax over the key axis.  Row max / sum / reciprocal stay in f32; exp
    # runs in bf16 on chips with a bf16 EUP (v6e/v7x).  The 1/denominator is
    # folded in after the PV matmul (L*Cv multiplies instead of L*L).
    sim = sim - jnp.max(sim, axis=-1, keepdims=True)
    p = jnp.exp(sim.astype(exp_dtype))
    denom = jnp.sum(p, axis=-1, keepdims=True, dtype=jnp.float32)

    ctx = jnp.einsum("blm,bmv->blv", p.astype(jnp.bfloat16), v,
                     preferred_element_type=jnp.float32)
    ctx = ctx * pl.reciprocal(denom, approx=True)

    # Output 1x1 conv W; lane-dense bf16 store (padding channels sliced outside).
    out2 = jnp.dot(ctx.astype(jnp.bfloat16).reshape(b * L, -1), ww_ref[...],
                   preferred_element_type=jnp.float32) + bw_ref[...]
    o_ref[...] = out2.reshape(b, sh, sw, cout).astype(o_ref.dtype)


def pyramid_self_attention(x_nchw, params, *, key_channels, value_channels,
                           out_channels, scale, block_batch=None):
    N, Cin, H, W = x_nchw.shape
    assert H % scale == 0 and W % scale == 0, "H, W must be divisible by scale"
    step_h, step_w = H // scale, W // scale
    assert step_w % 8 == 0, "pyramid block width must be a multiple of 8 (sublane)"
    L = step_h * step_w

    # Lane/MXU-aligned channel dims (no-op for production channel counts).
    cin_p = _round_up(Cin, 128)
    ck_p = _round_up(key_channels, 128)
    cv_p = _round_up(value_channels, 128)
    cout_p = _round_up(out_channels, 128)
    ckv_p = ck_p + cv_p
    # TODO(synk): for out_channels far below 128, pack (step_w * cout) into the
    # lane dim instead of padding to 128 to avoid writeback amplification.

    vmem_budget = _vmem_budget_bytes()
    if block_batch is None:
        block_batch = _choose_block_batch(N, L, cin_p, ckv_p, cv_p, cout_p,
                                          scale, vmem_budget)
    assert N % block_batch == 0

    # ---- Fold inference BN + key_channels^-0.5 similarity scale into the
    # shared f_key/f_query 1x1 conv (host-side, once).  q and k share the
    # projection, so each side carries key_channels^-0.25.
    eps = 1e-5
    inv_std = 1.0 / jnp.sqrt(params["bn_var"] + eps)
    bn_scale = params["bn_gamma"] * inv_std
    qk_scale = jnp.float32(key_channels) ** -0.25
    wqk = params["w_key"] * bn_scale[None, :] * qk_scale                 # (Cin, Ck)
    bqk = ((params["b_key"] - params["bn_mean"]) * bn_scale
           + params["bn_beta"]) * qk_scale                               # (Ck,)

    # Fused (q/k | v) projection weight & bias for the single in-kernel matmul.
    wqkv = jnp.concatenate(
        [_pad2(wqk, cin_p, ck_p), _pad2(params["w_value"], cin_p, cv_p)],
        axis=1).astype(jnp.bfloat16)                               # (Cin_p, Ck_p+Cv_p)
    bqkv = jnp.concatenate(
        [_pad_last(bqk, ck_p), _pad_last(params["b_value"], cv_p)]
    ).reshape(1, ckv_p).astype(jnp.float32)
    ww = _pad2(params["w_out"], cv_p, cout_p).astype(jnp.bfloat16)
    bw = _pad_last(params["b_out"], cout_p).reshape(1, cout_p).astype(jnp.float32)

    # NCHW -> NHWC (layout glue) + bf16 + channel padding.  Pyramid blocks are
    # sliced directly by the BlockSpec — no packed copy round-trips HBM.
    x_nhwc = _pad_last(jnp.transpose(x_nchw, (0, 2, 3, 1)).astype(jnp.bfloat16),
                       cin_p)

    kernel = functools.partial(_pyramid_attn_kernel, ck_p=ck_p,
                               exp_dtype=_exp_dtype_for_device())

    def build(single_buffer_weights):
        if single_buffer_weights:
            const = lambda shape: pl.BlockSpec(
                shape, lambda n, i, j: (0,) * len(shape),
                pipeline_mode=pl.Buffered(1))
        else:
            const = lambda shape: pl.BlockSpec(
                shape, lambda n, i, j: (0,) * len(shape))
        return pl.pallas_call(
            kernel,
            out_shape=jax.ShapeDtypeStruct((N, H, W, cout_p), jnp.bfloat16),
            grid_spec=pltpu.PrefetchScalarGridSpec(
                num_scalar_prefetch=0,
                grid=(N // block_batch, scale, scale),
                in_specs=[
                    pl.BlockSpec((block_batch, step_h, step_w, cin_p),
                                 lambda n, i, j: (n, i, j, 0)),
                    const(wqkv.shape), const(bqkv.shape),
                    const(ww.shape), const(bw.shape),
                ],
                out_specs=pl.BlockSpec((block_batch, step_h, step_w, cout_p),
                                       lambda n, i, j: (n, i, j, 0)),
            ),
            compiler_params=pltpu.CompilerParams(
                dimension_semantics=("parallel", "parallel", "parallel"),
                vmem_limit_bytes=int(vmem_budget),
            ),
        )

    args = (x_nhwc, wqkv, bqkv, ww, bw)
    try:
        # Constant-index weights never re-fetch; single-buffer them to hand back
        # their second VMEM buffer.
        out_padded = build(True)(*args)
    except Exception:
        # pipeline_mode=pl.Buffered support varies across jax versions; fall
        # back to the default double-buffered weight blocks (small cost).
        out_padded = build(False)(*args)

    out = out_padded[..., :out_channels]            # bf16 slice (drop lane padding)
    out = jnp.transpose(out, (0, 3, 1, 2))          # NHWC -> NCHW, still bf16
    return out.astype(x_nchw.dtype)


def _reference(x_nchw, params, *, key_channels, value_channels, out_channels, scale):
    """Pure-JAX f32 reference mirroring the PyTorch forward (inference BN)."""
    N, Cin, H, W = x_nchw.shape
    x = jnp.transpose(x_nchw, (0, 2, 3, 1))
    eps = 1e-5
    kq = x @ params["w_key"] + params["b_key"]
    kq = ((kq - params["bn_mean"]) / jnp.sqrt(params["bn_var"] + eps)
          * params["bn_gamma"] + params["bn_beta"])
    v = x @ params["w_value"] + params["b_value"]

    step_h, step_w = H // scale, W // scale
    rows = []
    for i in range(scale):
        cols = []
        for j in range(scale):
            sl = (slice(None), slice(i * step_h, (i + 1) * step_h),
                  slice(j * step_w, (j + 1) * step_w), slice(None))
            q_l = kq[sl].reshape(N, -1, key_channels)
            k_l = kq[sl].reshape(N, -1, key_channels)
            v_l = v[sl].reshape(N, -1, value_channels)
            sim = jnp.einsum("blk,bmk->blm", q_l, k_l) * key_channels ** -0.5
            sim = jax.nn.softmax(sim, axis=-1)
            ctx = jnp.einsum("blm,bmv->blv", sim, v_l)
            cols.append(ctx.reshape(N, step_h, step_w, value_channels))
        rows.append(jnp.concatenate(cols, axis=2))
    ctx_full = jnp.concatenate(rows, axis=1)
    out = ctx_full @ params["w_out"] + params["b_out"]
    return jnp.transpose(out, (0, 3, 1, 2))


if __name__ == "__main__":
    # Small, module-consistent shapes.
    N, Cin, H, W = 2, 4, 16, 16
    key_channels, value_channels, out_channels, scale = 8, 8, 4, 2

    key = jax.random.PRNGKey(0)
    ks = jax.random.split(key, 10)
    x = jax.random.normal(ks[0], (N, Cin, H, W), dtype=jnp.float32)

    # Deterministic parameters (shapes per the module __init__; W is random
    # here instead of the module's constant-zero init so the output is non-trivial).
    params = {
        "w_key":   0.2 * jax.random.normal(ks[1], (Cin, key_channels), jnp.float32),
        "b_key":   0.1 * jax.random.normal(ks[2], (key_channels,), jnp.float32),
        "bn_gamma": 1.0 + 0.1 * jax.random.normal(ks[3], (key_channels,), jnp.float32),
        "bn_beta":  0.1 * jax.random.normal(ks[4], (key_channels,), jnp.float32),
        "bn_mean":  0.05 * jax.random.normal(ks[5], (key_channels,), jnp.float32),
        "bn_var":   jnp.abs(1.0 + 0.1 * jax.random.normal(ks[6], (key_channels,), jnp.float32)),
        "w_value": 0.2 * jax.random.normal(ks[7], (Cin, value_channels), jnp.float32),
        "b_value": 0.1 * jax.random.normal(ks[8], (value_channels,), jnp.float32),
        "w_out":   0.2 * jax.random.normal(ks[9], (value_channels, out_channels), jnp.float32),
        "b_out":   jnp.zeros((out_channels,), jnp.float32),
    }

    out = pyramid_self_attention(
        x, params, key_channels=key_channels, value_channels=value_channels,
        out_channels=out_channels, scale=scale)
    out = jax.block_until_ready(out)

    ref = _reference(
        x, params, key_channels=key_channels, value_channels=value_channels,
        out_channels=out_channels, scale=scale)
    # bf16 MXU inputs/output + approx reciprocal -> widened (still tight) tolerance.
    np.testing.assert_allclose(np.asarray(out), np.asarray(ref), rtol=2e-2, atol=2e-2)

    assert out.shape == (N, out_channels, H, W)
    print("KERNEL_OK")
</pallas_src>

<mosaic_0001>
module attributes {stable_mosaic.version = 11 : i64} {
  func.func @_pyramid_attn_kernel(%arg0: i32, %arg1: i32, %arg2: i32, %arg3: memref<2x8x8x128xbf16, #tpu.memory_space<vmem>>, %arg4: memref<128x256xbf16, #tpu.memory_space<vmem>>, %arg5: memref<1x256xf32, #tpu.memory_space<vmem>>, %arg6: memref<128x128xbf16, #tpu.memory_space<vmem>>, %arg7: memref<1x128xf32, #tpu.memory_space<vmem>>, %arg8: memref<2x8x8x128xbf16, #tpu.memory_space<vmem>>) attributes {dimension_semantics = [#tpu.dimension_semantics<parallel>, #tpu.dimension_semantics<parallel>, #tpu.dimension_semantics<parallel>], iteration_bounds = array<i64: 1, 2, 2>, scalar_prefetch = 0 : i64, scratch_operands = 0 : i64, tpu.core_type = #tpu.core_type<tc>, window_params = [{transform_indices = @transform_0, window_bounds = array<i64: 2, 8, 8, 128>}, {pipeline_mode = #tpu.pipeline_mode<synchronous>, transform_indices = @transform_1, window_bounds = array<i64: 128, 256>}, {pipeline_mode = #tpu.pipeline_mode<synchronous>, transform_indices = @transform_2, window_bounds = array<i64: 1, 256>}, {pipeline_mode = #tpu.pipeline_mode<synchronous>, transform_indices = @transform_3, window_bounds = array<i64: 128, 128>}, {pipeline_mode = #tpu.pipeline_mode<synchronous>, transform_indices = @transform_4, window_bounds = array<i64: 1, 128>}, {transform_indices = @transform_5, window_bounds = array<i64: 2, 8, 8, 128>}]} {
    %c0 = arith.constant 0 : index
    %c0_0 = arith.constant 0 : index
    %c0_1 = arith.constant 0 : index
    %c0_2 = arith.constant 0 : index
    %0 = vector.load %arg3[%c0, %c0_0, %c0_1, %c0_2] : memref<2x8x8x128xbf16, #tpu.memory_space<vmem>>, vector<2x8x8x128xbf16>
    %1 = vector.shape_cast %0 : vector<2x8x8x128xbf16> to vector<128x128xbf16>
    %c0_3 = arith.constant 0 : index
    %c0_4 = arith.constant 0 : index
    %2 = vector.load %arg4[%c0_3, %c0_4] : memref<128x256xbf16, #tpu.memory_space<vmem>>, vector<128x256xbf16>
    %cst = arith.constant dense<0.000000e+00> : vector<128x256xf32>
    %3 = tpu.matmul %1, %2, %cst {dimension_numbers = #tpu.dot_dimension_numbers<[1], [0], [0], [1], [0, 0, 1, 1], [], []>} : vector<128x128xbf16>, vector<128x256xbf16>, vector<128x256xf32> -> vector<128x256xf32>
    %c0_5 = arith.constant 0 : index
    %c0_6 = arith.constant 0 : index
    %4 = vector.load %arg5[%c0_5, %c0_6] : memref<1x256xf32, #tpu.memory_space<vmem>>, vector<1x256xf32>
    %5 = vector.broadcast %4 : vector<1x256xf32> to vector<128x256xf32>
    %6 = arith.addf %3, %5 : vector<128x256xf32>
    %7 = arith.truncf %6 : vector<128x256xf32> to vector<128x256xbf16>
    %8 = vector.extract_strided_slice %7 {offsets = [0, 0], sizes = [128, 128], strides = [1, 1]} : vector<128x256xbf16> to vector<128x128xbf16>
    %9 = vector.shape_cast %8 : vector<128x128xbf16> to vector<2x64x128xbf16>
    %10 = vector.extract_strided_slice %7 {offsets = [0, 128], sizes = [128, 128], strides = [1, 1]} : vector<128x256xbf16> to vector<128x128xbf16>
    %11 = vector.shape_cast %10 : vector<128x128xbf16> to vector<2x64x128xbf16>
    "tpu.trace_start"() <{level = 10 : i32, message = "blk,bmk->blm"}> : () -> ()
    %cst_7 = arith.constant dense<0.000000e+00> : vector<2x64x64xf32>
    %12 = tpu.matmul %9, %9, %cst_7 {dimension_numbers = #tpu.dot_dimension_numbers<[2], [2], [1], [1], [0, 0, 0, 1, 1, 1], [0], [0]>} : vector<2x64x128xbf16>, vector<2x64x128xbf16>, vector<2x64x64xf32> -> vector<2x64x64xf32>
    "tpu.trace_stop"() : () -> ()
    %cst_8 = arith.constant dense<0xFF800000> : vector<2x64xf32>
    %13 = vector.multi_reduction <maximumf>, %12, %cst_8 [2] : vector<2x64x64xf32> to vector<2x64xf32>
    %14 = vector.shape_cast %13 : vector<2x64xf32> to vector<2x64x1xf32>
    %15 = vector.broadcast %14 : vector<2x64x1xf32> to vector<2x64x64xf32>
    %16 = arith.subf %12, %15 : vector<2x64x64xf32>
    %17 = arith.truncf %16 : vector<2x64x64xf32> to vector<2x64x64xbf16>
    %18 = math.exp %17 : vector<2x64x64xbf16>
    %19 = arith.extf %18 : vector<2x64x64xbf16> to vector<2x64x64xf32>
    %cst_9 = arith.constant dense<0.000000e+00> : vector<2x64xf32>
    %20 = vector.multi_reduction <add>, %19, %cst_9 [2] : vector<2x64x64xf32> to vector<2x64xf32>
    %21 = vector.shape_cast %20 : vector<2x64xf32> to vector<2x64x1xf32>
    "tpu.trace_start"() <{level = 10 : i32, message = "blm,bmv->blv"}> : () -> ()
    %cst_10 = arith.constant dense<0.000000e+00> : vector<2x64x128xf32>
    %22 = tpu.matmul %18, %11, %cst_10 {dimension_numbers = #tpu.dot_dimension_numbers<[2], [1], [1], [2], [0, 0, 0, 1, 1, 2], [0], [0]>} : vector<2x64x64xbf16>, vector<2x64x128xbf16>, vector<2x64x128xf32> -> vector<2x64x128xf32>
    "tpu.trace_stop"() : () -> ()
    %23 = tpu.reciprocal %21 {approx = true} : vector<2x64x1xf32> -> vector<2x64x1xf32>
    %24 = vector.broadcast %23 : vector<2x64x1xf32> to vector<2x64x128xf32>
    %25 = arith.mulf %22, %24 : vector<2x64x128xf32>
    %26 = arith.truncf %25 : vector<2x64x128xf32> to vector<2x64x128xbf16>
    %27 = vector.shape_cast %26 : vector<2x64x128xbf16> to vector<128x128xbf16>
    %c0_11 = arith.constant 0 : index
    %c0_12 = arith.constant 0 : index
    %28 = vector.load %arg6[%c0_11, %c0_12] : memref<128x128xbf16, #tpu.memory_space<vmem>>, vector<128x128xbf16>
    %cst_13 = arith.constant dense<0.000000e+00> : vector<128x128xf32>
    %29 = tpu.matmul %27, %28, %cst_13 {dimension_numbers = #tpu.dot_dimension_numbers<[1], [0], [0], [1], [0, 0, 1, 1], [], []>} : vector<128x128xbf16>, vector<128x128xbf16>, vector<128x128xf32> -> vector<128x128xf32>
    %c0_14 = arith.constant 0 : index
    %c0_15 = arith.constant 0 : index
    %30 = vector.load %arg7[%c0_14, %c0_15] : memref<1x128xf32, #tpu.memory_space<vmem>>, vector<1x128xf32>
    %31 = vector.broadcast %30 : vector<1x128xf32> to vector<128x128xf32>
    %32 = arith.addf %29, %31 : vector<128x128xf32>
    %33 = vector.shape_cast %32 : vector<128x128xf32> to vector<2x8x8x128xf32>
    %34 = arith.truncf %33 : vector<2x8x8x128xf32> to vector<2x8x8x128xbf16>
    %c0_16 = arith.constant 0 : index
    %c0_17 = arith.constant 0 : index
    %c0_18 = arith.constant 0 : index
    %c0_19 = arith.constant 0 : index
    %35 = vector.load %arg8[%c0_16, %c0_17, %c0_18, %c0_19] : memref<2x8x8x128xbf16, #tpu.memory_space<vmem>>, vector<2x8x8x128xbf16>
    tpu.vector_store %arg8[%c0_16, %c0_17, %c0_18, %c0_19], %34 {strides = array<i32>} : memref<2x8x8x128xbf16, #tpu.memory_space<vmem>>, vector<2x8x8x128xbf16>,
    return
  }
  func.func @transform_0(%arg0: i32, %arg1: i32, %arg2: i32) -> (i32, i32, i32, i32) {
    %c0_i32 = arith.constant 0 : i32
    %c0_i32_0 = arith.constant 0 : i32
    return %arg0, %arg1, %arg2, %c0_i32 : i32, i32, i32, i32
  }
  func.func @transform_1(%arg0: i32, %arg1: i32, %arg2: i32) -> (i32, i32) {
    %c0_i32 = arith.constant 0 : i32
    %c0_i32_0 = arith.constant 0 : i32
    %c0_i32_1 = arith.constant 0 : i32
    return %c0_i32, %c0_i32_0 : i32, i32
  }
  func.func @transform_2(%arg0: i32, %arg1: i32, %arg2: i32) -> (i32, i32) {
    %c0_i32 = arith.constant 0 : i32
    %c0_i32_0 = arith.constant 0 : i32
    %c0_i32_1 = arith.constant 0 : i32
    return %c0_i32, %c0_i32_0 : i32, i32
  }
  func.func @transform_3(%arg0: i32, %arg1: i32, %arg2: i32) -> (i32, i32) {
    %c0_i32 = arith.constant 0 : i32
    %c0_i32_0 = arith.constant 0 : i32
    %c0_i32_1 = arith.constant 0 : i32
    return %c0_i32, %c0_i32_0 : i32, i32
  }
  func.func @transform_4(%arg0: i32, %arg1: i32, %arg2: i32) -> (i32, i32) {
    %c0_i32 = arith.constant 0 : i32
    %c0_i32_0 = arith.constant 0 : i32
    %c0_i32_1 = arith.constant 0 : i32
    return %c0_i32, %c0_i32_0 : i32, i32
  }
  func.func @transform_5(%arg0: i32, %arg1: i32, %arg2: i32) -> (i32, i32, i32, i32) {
    %c0_i32 = arith.constant 0 : i32
    %c0_i32_0 = arith.constant 0 : i32
    return %arg0, %arg1, %arg2, %c0_i32 : i32, i32, i32, i32
  }
}

module attributes {stable_mosaic.version = 11 : i64} {
  func.func @_pyramid_attn_kernel(%arg0: i32, %arg1: i32, %arg2: i32, %arg3: memref<2x8x8x128xbf16, #tpu.memory_space<vmem>>, %arg4: memref<128x256xbf16, #tpu.memory_space<vmem>>, %arg5: memref<1x256xf32, #tpu.memory_space<vmem>>, %arg6: memref<128x128xbf16, #tpu.memory_space<vmem>>, %arg7: memref<1x128xf32, #tpu.memory_space<vmem>>, %arg8: memref<2x8x8x128xbf16, #tpu.memory_space<vmem>>) attributes {dimension_semantics = [#tpu.dimension_semantics<parallel>, #tpu.dimension_semantics<parallel>, #tpu.dimension_semantics<parallel>], iteration_bounds = array<i64: 1, 2, 2>, scalar_prefetch = 0 : i64, scratch_operands = 0 : i64, tpu.core_type = #tpu.core_type<tc>, window_params = [{transform_indices = @transform_0, window_bounds = array<i64: 2, 8, 8, 128>}, {pipeline_mode = #tpu.pipeline_mode<synchronous>, transform_indices = @transform_1, window_bounds = array<i64: 128, 256>}, {pipeline_mode = #tpu.pipeline_mode<synchronous>, transform_indices = @transform_2, window_bounds = array<i64: 1, 256>}, {pipeline_mode = #tpu.pipeline_mode<synchronous>, transform_indices = @transform_3, window_bounds = array<i64: 128, 128>}, {pipeline_mode = #tpu.pipeline_mode<synchronous>, transform_indices = @transform_4, window_bounds = array<i64: 1, 128>}, {transform_indices = @transform_5, window_bounds = array<i64: 2, 8, 8, 128>}]} {
    %c0 = arith.constant 0 : index
    %c0_0 = arith.constant 0 : index
    %c0_1 = arith.constant 0 : index
    %c0_2 = arith.constant 0 : index
    %0 = vector.load %arg3[%c0, %c0_0, %c0_1, %c0_2] : memref<2x8x8x128xbf16, #tpu.memory_space<vmem>>, vector<2x8x8x128xbf16>
    %1 = vector.shape_cast %0 : vector<2x8x8x128xbf16> to vector<128x128xbf16>
    %c0_3 = arith.constant 0 : index
    %c0_4 = arith.constant 0 : index
    %2 = vector.load %arg4[%c0_3, %c0_4] : memref<128x256xbf16, #tpu.memory_space<vmem>>, vector<128x256xbf16>
    %cst = arith.constant dense<0.000000e+00> : vector<128x256xf32>
    %3 = tpu.matmul %1, %2, %cst {dimension_numbers = #tpu.dot_dimension_numbers<[1], [0], [0], [1], [0, 0, 1, 1], [], []>} : vector<128x128xbf16>, vector<128x256xbf16>, vector<128x256xf32> -> vector<128x256xf32>
    %c0_5 = arith.constant 0 : index
    %c0_6 = arith.constant 0 : index
    %4 = vector.load %arg5[%c0_5, %c0_6] : memref<1x256xf32, #tpu.memory_space<vmem>>, vector<1x256xf32>
    %5 = vector.broadcast %4 : vector<1x256xf32> to vector<128x256xf32>
    %6 = arith.addf %3, %5 : vector<128x256xf32>
    %7 = arith.truncf %6 : vector<128x256xf32> to vector<128x256xbf16>
    %8 = vector.extract_strided_slice %7 {offsets = [0, 0], sizes = [128, 128], strides = [1, 1]} : vector<128x256xbf16> to vector<128x128xbf16>
    %9 = vector.shape_cast %8 : vector<128x128xbf16> to vector<2x64x128xbf16>
    %10 = vector.extract_strided_slice %7 {offsets = [0, 128], sizes = [128, 128], strides = [1, 1]} : vector<128x256xbf16> to vector<128x128xbf16>
    %11 = vector.shape_cast %10 : vector<128x128xbf16> to vector<2x64x128xbf16>
    "tpu.trace_start"() <{level = 10 : i32, message = "blk,bmk->blm"}> : () -> ()
    %cst_7 = arith.constant dense<0.000000e+00> : vector<2x64x64xf32>
    %12 = tpu.matmul %9, %9, %cst_7 {dimension_numbers = #tpu.dot_dimension_numbers<[2], [2], [1], [1], [0, 0, 0, 1, 1, 1], [0], [0]>} : vector<2x64x128xbf16>, vector<2x64x128xbf16>, vector<2x64x64xf32> -> vector<2x64x64xf32>
    "tpu.trace_stop"() : () -> ()
    %cst_8 = arith.constant dense<0xFF800000> : vector<2x64xf32>
    %13 = vector.multi_reduction <maximumf>, %12, %cst_8 [2] : vector<2x64x64xf32> to vector<2x64xf32>
    %14 = vector.shape_cast %13 : vector<2x64xf32> to vector<2x64x1xf32>
    %15 = vector.broadcast %14 : vector<2x64x1xf32> to vector<2x64x64xf32>
    %16 = arith.subf %12, %15 : vector<2x64x64xf32>
    %17 = arith.truncf %16 : vector<2x64x64xf32> to vector<2x64x64xbf16>
    %18 = math.exp %17 : vector<2x64x64xbf16>
    %19 = arith.extf %18 : vector<2x64x64xbf16> to vector<2x64x64xf32>
    %cst_9 = arith.constant dense<0.000000e+00> : vector<2x64xf32>
    %20 = vector.multi_reduction <add>, %19, %cst_9 [2] : vector<2x64x64xf32> to vector<2x64xf32>
    %21 = vector.shape_cast %20 : vector<2x64xf32> to vector<2x64x1xf32>
    "tpu.trace_start"() <{level = 10 : i32, message = "blm,bmv->blv"}> : () -> ()
    %cst_10 = arith.constant dense<0.000000e+00> : vector<2x64x128xf32>
    %22 = tpu.matmul %18, %11, %cst_10 {dimension_numbers = #tpu.dot_dimension_numbers<[2], [1], [1], [2], [0, 0, 0, 1, 1, 2], [0], [0]>} : vector<2x64x64xbf16>, vector<2x64x128xbf16>, vector<2x64x128xf32> -> vector<2x64x128xf32>
    "tpu.trace_stop"() : () -> ()
    %23 = tpu.reciprocal %21 {approx = true} : vector<2x64x1xf32> -> vector<2x64x1xf32>
    %24 = vector.broadcast %23 : vector<2x64x1xf32> to vector<2x64x128xf32>
    %25 = arith.mulf %22, %24 : vector<2x64x128xf32>
    %26 = arith.truncf %25 : vector<2x64x128xf32> to vector<2x64x128xbf16>
    %27 = vector.shape_cast %26 : vector<2x64x128xbf16> to vector<128x128xbf16>
    %c0_11 = arith.constant 0 : index
    %c0_12 = arith.constant 0 : index
    %28 = vector.load %arg6[%c0_11, %c0_12] : memref<128x128xbf16, #tpu.memory_space<vmem>>, vector<128x128xbf16>
    %cst_13 = arith.constant dense<0.000000e+00> : vector<128x128xf32>
    %29 = tpu.matmul %27, %28, %cst_13 {dimension_numbers = #tpu.dot_dimension_numbers<[1], [0], [0], [1], [0, 0, 1, 1], [], []>} : vector<128x128xbf16>, vector<128x128xbf16>, vector<128x128xf32> -> vector<128x128xf32>
    %c0_14 = arith.constant 0 : index
    %c0_15 = arith.constant 0 : index
    %30 = vector.load %arg7[%c0_14, %c0_15] : memref<1x128xf32, #tpu.memory_space<vmem>>, vector<1x128xf32>
    %31 = vector.broadcast %30 : vector<1x128xf32> to vector<128x128xf32>
    %32 = arith.addf %29, %31 : vector<128x128xf32>
    %33 = vector.shape_cast %32 : vector<128x128xf32> to vector<2x8x8x128xf32>
    %34 = arith.truncf %33 : vector<2x8x8x128xf32> to vector<2x8x8x128xbf16>
    %c0_16 = arith.constant 0 : index
    %c0_17 = arith.constant 0 : index
    %c0_18 = arith.constant 0 : index
    %c0_19 = arith.constant 0 : index
    %35 = vector.load %arg8[%c0_16, %c0_17, %c0_18, %c0_19] : memref<2x8x8x128xbf16, #tpu.memory_space<vmem>>, vector<2x8x8x128xbf16>
    tpu.vector_store %arg8[%c0_16, %c0_17, %c0_18, %c0_19], %34 {strides = array<i32>} : memref<2x8x8x128xbf16, #tpu.memory_space<vmem>>, vector<2x8x8x128xbf16>,
    return
  }
  func.func @transform_0(%arg0: i32, %arg1: i32, %arg2: i32) -> (i32, i32, i32, i32) {
    %c0_i32 = arith.constant 0 : i32
    %c0_i32_0 = arith.constant 0 : i32
    return %arg0, %arg1, %arg2, %c0_i32 : i32, i32, i32, i32
  }
  func.func @transform_1(%arg0: i32, %arg1: i32, %arg2: i32) -> (i32, i32) {
    %c0_i32 = arith.constant 0 : i32
    %c0_i32_0 = arith.constant 0 : i32
    %c0_i32_1 = arith.constant 0 : i32
    return %c0_i32, %c0_i32_0 : i32, i32
  }
  func.func @transform_2(%arg0: i32, %arg1: i32, %arg2: i32) -> (i32, i32) {
    %c0_i32 = arith.constant 0 : i32
    %c0_i32_0 = arith.constant 0 : i32
    %c0_i32_1 = arith.constant 0 : i32
    return %c0_i32, %c0_i32_0 : i32, i32
  }
  func.func @transform_3(%arg0: i32, %arg1: i32, %arg2: i32) -> (i32, i32) {
    %c0_i32 = arith.constant 0 : i32
    %c0_i32_0 = arith.constant 0 : i32
    %c0_i32_1 = arith.constant 0 : i32
    return %c0_i32, %c0_i32_0 : i32, i32
  }
  func.func @transform_4(%arg0: i32, %arg1: i32, %arg2: i32) -> (i32, i32) {
    %c0_i32 = arith.constant 0 : i32
    %c0_i32_0 = arith.constant 0 : i32
    %c0_i32_1 = arith.constant 0 : i32
    return %c0_i32, %c0_i32_0 : i32, i32
  }
  func.func @transform_5(%arg0: i32, %arg1: i32, %arg2: i32) -> (i32, i32, i32, i32) {
    %c0_i32 = arith.constant 0 : i32
    %c0_i32_0 = arith.constant 0 : i32
    return %arg0, %arg1, %arg2, %c0_i32 : i32, i32, i32, i32
  }
}

</mosaic_0001>

<bundles_post_ra>
// kernel: tpu_custom_call.1
= control target key start
LH: loop header
LB: loop body
LE: loop exit
PB: predicated region body
PF: predicated region fallthrough
CT: control target
= control target key end

     0   :  { %s2526_s0 = inlined_call_operand.hbm [shape: bf16[2,16,16,128], index: 0, kind: input, shape index: {}]   ;;  %s2527_s1 = inlined_call_operand.hbm [shape: bf16[128,256], index: 1, kind: input, shape index: {}]   ;;  %s2528_s2 = inlined_call_operand.vmem [shape: f32[1,256], index: 2, kind: input, shape index: {}]   ;;  %s2529_s3 = inlined_call_operand.hbm [shape: bf16[128,128], index: 3, kind: input, shape index: {}]   ;;  %s2530_s4 = inlined_call_operand.vmem [shape: f32[1,128], index: 4, kind: input, shape index: {}]   ;;  %s2531_s5 = inlined_call_operand.hbm [shape: bf16[2,16,16,128], index: 5, kind: output, shape index: {}]  }
   0x1   :  { %2542 = sst [smem:[#allocation22_spill]] %s2531_s5 }
   0x2   :  { %10 = vsyncpa [#allocation3], 0 }
   0x3   :  { %12 = vsyncpa [#allocation3 + $0x1], 0 }
   0x4   :  { %13 = vsyncpa [#allocation6], 0 }
   0x5   :  { %14 = vsyncpa [#allocation4], 0 }
   0x6   :  { %16 = vsyncpa [#allocation4 + $0x1], 0  ;;  %s2138_s18 = smov 0   ;;  %s2140_s19 = smov 0  }
   0x7   :  { %s2142_s20 = smov 0   ;;  %s2144_s21 = smov 0  }
   0x8   :  { %s2146_s22 = smov 0   ;;  %s2148_s23 = smov 0  }
   0x9   :  { %s2150_s24 = smov 0   ;;  %s2152_s25 = smov 0  }
   0xa LB: > { %2543 = sst [smem:[#allocation17_spill]] %s2056_s18  ;;  %s1482_s26 = sadd.s32 4294967295, %s2084_s25   ;;  %s2084_s25 = sphi %s2152_s25, %s22_s25   ;;  %s2080_s24 = sphi %s2150_s24, %s2573_s24   ;;  %s2076_s23 = sphi %s2148_s23, %s2572_s23   ;;  %s2072_s22 = sphi %s2146_s22, %s2571_s22   ;;  %s2068_s21 = sphi %s2144_s21, %s2570_s21   ;;  %s2064_s20 = sphi %s2142_s20, %s2569_s20   ;;  %s2060_s19 = sphi %s2140_s19, %s2568_s19   ;;  %s2056_s18 = sphi %s2138_s18, %s2567_s18  }
   0xb   : > { %s1483_s27 = sadd.s32 4294967294, %s2084_s25   ;;  %s34_s28 = sadd.s32 1, %s2076_s23 }
   0xc   : > { %s37_s29 = sadd.s32 1, %s2080_s24  ;;  %p35_p0 = scmp.ge.s32.totalorder %s34_s28, 2 }
   0xd   : > { %s52_s30 = sadd.s32 1, %s2064_s20  ;;  %p59_p1 = scmp.ne.s32.totalorder %s2064_s20, %s2060_s19 }
   0xe   : > { %p60_p2 = scmp.eq.s32.totalorder %s2084_s25, 0  ;;  %s2575_s28 = smov (%p35_p0, %s34_s28), 0 }
   0xf   : > { %2544 = sst [smem:[#allocation18_spill]] %s2575_s28  ;;  %s2577_s29 = smov (!%p35_p0, %s37_s29), %s2080_s24 }
  0x10   : > { %s48_s6 = ssub.s32 %s2076_s23, %s2575_s28  ;;  %p2191_p3 = por %p60_p2, %p59_p1 }
  0x11   : > { %p39_p4 = scmp.ge.s32.totalorder %s2577_s29, 2  ;;  %p65_p5 = scmp.ne.s32.totalorder %s2060_s19, %s2056_s18 }
  0x12   : > { %s2545_s7 = scalar_select %p2191_p3, 1, 0 }
  0x13   : > { %p2197_p6 = scmp.eq.s32.totalorder %s1482_s26, 0  ;;  %p177_p7 = scmp.eq.s32.totalorder %s1482_s26, 3 }
  0x14   : > { %s2579_s29 = smov (%p39_p4, %s2577_s29), 0  ;;  %p183_p10 = scmp.eq.s32.totalorder %s1483_s27, 3 }
  0x15   : > { %s2546_s8 = scalar_select %p2197_p6, 1, 0 }
  0x16   : > { %2547 = sst [smem:[#allocation19_spill]] %s2579_s29  ;;  %p2205_p8 = por %p2197_p6, %p65_p5 }
  0x17   : > { %p2209_p9 = por %p177_p7, %p59_p1  ;;  %s46_s11 = ssub.s32 %s2080_s24, %s2579_s29 }
  0x18   : > { %s2548_s9 = scalar_select %p2205_p8, 1, 0 }
  0x19   : > { %s2549_s10 = scalar_select %p2209_p9, 1, 0 }
  0x1a   : > { %s49_s12 = sor.u32 %s48_s6, %s46_s11  ;;  %p1484_p11 = scmp.ge.s32.totalorder %s2084_s25, 1 }
  0x1b   : > { %p50_p12 = scmp.eq.s32.totalorder %s49_s12, 0  ;;  %p2216_p13 = por %p183_p10, %p65_p5 }
  0x1c   : > { %p190_p0 = scmp.lt.s32.totalorder %s2084_s25, 5  ;;  %s2086_s16 = smov [#allocation5]  }
  0x1d   : > { %s2550_s13 = scalar_select %p2216_p13, 1, 0 }
  0x1e   : > { %s2222_s14 = scalar_select %p50_p12, %s2064_s20, %s52_s30  }
  0x1f   : > { %2551 = sst [smem:[#allocation20_spill]] %s2550_s13  ;;  %p2224_p2 = pnand %p1484_p11, %p190_p0 }
  0x20   : > { %2552 = sst [smem:[#allocation21_spill]] %s2222_s14  ;;  %s202_s17 = sshll.u32 %s2086_s16, 4  ;;  %s203_s17 = int_to_ptr.vmem [resolvable:$true] %s202_s17 }
  0x21   : > { %s2553_s15 = scalar_select %p2224_p2, 1, 0 }
  0x22   : > { %p1764_p1 = pneg %p2224_p2  ;;  %s2087_s27 = smov [#allocation7]  }
  0x23   : > { %s218_s30 = sshll.u32 %s2087_s27, 4  ;;  %s1954_s12 = scalar_lea.hbm %s2527_s1, 2048  ;;  %s2236_s30 = int_to_ptr.vmem [resolvable:$true] %s218_s30 }
  0x24   : > { %p2232_p4 = pnand %p1764_p1, %p2197_p6  ;;  %p1955_p5 = scmp.ne.s32.totalorder %s2527_s1, %s1954_s12 }
  0x25   : > { %p1961_p12 = scmp.lt.u32.totalorder %s1954_s12, %s2527_s1 }
  0x26   : > { %p1956_p7 = pneg %p2232_p4 }
  0x28   : > { %p1957_p10 = pnand %p1956_p7, %p1955_p5 }
  0x2a   : > { %p1958_p11 = pneg %p1957_p10 }
  0x2c   : > { %p1963_p0 = pnand %p1961_p12, %p1958_p11 }
  0x2e   : > { %1966 = shalt.err (!%p1963_p0)
}
  0x2f   : > { %s1967_s27 = scalar_lea.vmem %s203_s17, 2048  ;;  %p1975_p6 = scmp.lt.s32.totalorder %s203_s17, %s203_s17 }
  0x30   : > { %p1968_p1 = scmp.ne.s32.totalorder %s203_s17, %s1967_s27  ;;  %p1976_p8 = scmp.lt.s32.totalorder %s1967_s27, %s1967_s27 }
  0x32   : > { %p1970_p13 = pnand %p1968_p1, %p1956_p7  ;;  %p1977_p2 = por %p1976_p8, %p1975_p6 }
  0x34   : > { %p1971_p9 = pneg %p1970_p13 }
  0x36   : > { %p1978_p3 = pnand %p1977_p2, %p1971_p9 }
  0x38   : > { %1981 = shalt.err (!%p1978_p3)
}
  0x39   : > { %s2088_s29 = smov 128   ;;  %s2089_s6 = smov 8  }
  0x3a   : > { %1767 = dma.hbm_to_vmem [thread:$0]  (!%p2232_p4), %s2527_s1, 2048, %s203_s17, [#allocation6], %s2088_s29, %s2088_s29, %s2089_s6  }
  0x3b   : > { %s1982_s16 = scalar_lea.hbm %s2529_s3, 1024 }
  0x3c   : > { %p1983_p13 = scmp.ne.s32.totalorder %s2529_s3, %s1982_s16  ;;  %p1989_p8 = scmp.lt.u32.totalorder %s1982_s16, %s2529_s3 }
  0x3e   : > { %p1985_p3 = pnand %p1983_p13, %p1956_p7 }
  0x40   : > { %p1986_p6 = pneg %p1985_p3 }
  0x42   : > { %p1991_p9 = pnand %p1989_p8, %p1986_p6 }
  0x44   : > { %1994 = shalt.err (!%p1991_p9)
}
  0x45   : > { %s1995_s17 = scalar_lea.vmem %s2236_s30, 1024  ;;  %p2003_p11 = scmp.lt.s32.totalorder %s2236_s30, %s2236_s30 }
  0x46   : > { %p1996_p2 = scmp.ne.s32.totalorder %s2236_s30, %s1995_s17  ;;  %p2004_p12 = scmp.lt.s32.totalorder %s1995_s17, %s1995_s17 }
  0x48   : > { %p1998_p5 = pnand %p1996_p2, %p1956_p7  ;;  %p2005_p0 = por %p2004_p12, %p2003_p11 }
  0x4a   : > { %p1999_p10 = pneg %p1998_p5 }
  0x4c   : > { %p2006_p1 = pnand %p2005_p0, %p1999_p10 }
  0x4e   : > { %2009 = shalt.err (!%p2006_p1)
}
  0x4f   : > { %s2090_s5 = smov 64   ;;  %s2091_s18 = smov 4  }
  0x50   : > { %1770 = dma.hbm_to_vmem [thread:$0]  (!%p2232_p4), %s2529_s3, 1024, %s2236_s30, [#allocation6], %s2090_s5, %s2090_s5, %s2091_s18  }
  0x51   : > { %p1487_p13 = scmp.ge.s32.totalorder %s2084_s25, 4 }
  0x53   : > { %231 = sbr.rel (%p1487_p13) target bundleno = 107 (0x6b), region = 32 }
  0x5a   : > { %s235_s6 = sand.u32 1, %s2064_s20   ;;  %s1546_s28 = sshll.u32 %s2080_s24, 4 }
  0x5b   : > { %s1488_s14 = sshll.u32 %s235_s6, 6  ;;  %s246_s11 = sadd.s32 %s2076_s23, %s1546_s28 }
  0x5c   : > { %s1491_s26 = sshll.u32 %s246_s11, 6  ;;  %s239_s12 = scalar_lea.vmem [#allocation2], %s1488_s14 }
  0x5d   : > { %s263_s16 = sshll.u32 %s239_s12, 4  ;;  %s250_s17 = scalar_lea.hbm %s2526_s0, %s1491_s26  ;;  %s264_s16 = int_to_ptr.vmem [resolvable:$true] %s263_s16 }
  0x5e   : > { %p2555_p4 = scmp.ne.s32.totalorder %s2545_s7, 0  ;;  %s2092_s13 = smov 2048  }
  0x5f   : > { %s2093_s29 = smov 512   ;;  %s2094_s28 = smov 8  }
  0x60   : > { %s1743_s5 = scalar_select %p2555_p4, [#allocation0], [#allocation13] }
  0x61   : > { %1744 = sst [smem:[#allocation10]] (%p2555_p4), %s2092_s13  ;;  %s2095_s14 = smov 128  }
  0x62   : > { %s255_s18 = sld [smem:[%s1743_s5]]   ;;  %s2096_s11 = smov 64  }
  0x63   : > { %1745 = sst [smem:[#allocation10 + $0x1]] (%p2555_p4), %s2093_s29  ;;  %s2097_s26 = smov 4  }
  0x64   : > { %1746 = sst [smem:[#allocation10 + $0x2]] (%p2555_p4), %s2094_s28  ;;  %s236_s27 = scalar_lea.sflag [#allocation3], %s235_s6 }
  0x65   : > { %1747 = sst [smem:[#allocation10 + $0x3]] (%p2555_p4), %s2095_s14  ;;  %s2098_s5 = smov [#allocation9]  }
  0x66   : > { %1748 = sst [smem:[#allocation10 + $0x4]] (%p2555_p4), %s2096_s11 }
  0x67   : > { %1749 = sst [smem:[#allocation10 + $0x5]] (%p2555_p4), %s2097_s26 }
  0x68   : > { %s1492_s12 = sshll.u32 %s255_s18, 26 }
  0x69   : > { %s1493_s30 = sadd.s32 134217728, %s1492_s12 }
  0x6a   : > { %1750 = dma.general (%p2555_p4), %s250_s17, 1024, %s264_s16, %s236_s27, %s2098_s5, [#allocation10], %s1493_s30, 0  }
  0x6b PF: > { %p2556_p7 = scmp.ne.s32.totalorder %s2553_s15, 0 }
  0x6c   : > { %s2311_s13 = sand.u32 (!%p2556_p7), 1, %s2060_s19   ;;  %p2557_p3 = scmp.ne.s32.totalorder (!%p2556_p7), %s2548_s9, 0 }
  0x6d   : > { %288 = sbr.rel (%p2556_p7) target bundleno = 1275 (0x4fb), region = 40  ;;  %s1495_s29 = sshll.u32 (!%p2556_p7), %s2311_s13, 6 }
  0x6e   : > { %s291_s28 = scalar_lea.sflag (!%p2556_p7), [#allocation3], %s2311_s13  ;;  %s2317_s18 = scalar_lea.vmem (!%p2556_p7), [#allocation2], %s1495_s29 }
  0x74   : > { %2043 = dma.done.wait (%p2557_p3), %s291_s28, 1024  }
  0x75   : > { %2045 = vsyncadd (%p2557_p3), %s291_s28, 4294966272  ;;  %p2558_p6 = scmp.ne.s32.totalorder %s2546_s8, 0 }
  0x77   : > { %2047 = dma.done.wait (%p2558_p6), [#allocation6], 3072  }
  0x78   : > { %2049 = vsyncadd (%p2558_p6), [#allocation6], 4294964224  ;;  %v2099_v0 = vmov 0   ;;  %v1866_v1 = vld [vmem:[#allocation5 + $0x4] ss:$8 sps:$4 sm:$0xff]   ;;  %v1892_v19 = vld [vmem:[%s2317_s18 + $0x10] sm:$0xff]   ;;  %v368_v25 = vlaneseq }
  0x79   : > { %538 = vmatprep.mubr.bf16.mxu0 %v2099_v0  ;;  %v1868_v2 = vld [vmem:[#allocation5] ss:$8 sps:$4 sm:$0xff]   ;;  %506 = vmatprep.subr.bf16.mxu0 %v1866_v1  ;;  %v1869_v3 = vld [vmem:[#allocation5 + $0x14] ss:$8 sps:$4 sm:$0xff]   ;;  %v1871_v4 = vld [vmem:[#allocation5 + $0x10] ss:$8 sps:$4 sm:$0xff]  }
  0x7a   : > { %507 = vmatpush1.bf16.msra.mxu0 %v1868_v2  ;;  %v1872_v5 = vld [vmem:[#allocation5 + $0x24] ss:$8 sps:$4 sm:$0xff]   ;;  %v1874_v6 = vld [vmem:[#allocation5 + $0x20] ss:$8 sps:$4 sm:$0xff]   ;;  %v1875_v7 = vld [vmem:[#allocation5 + $0x34] ss:$8 sps:$4 sm:$0xff]  }
  0x7b   : > { %508 = vmatprep.subr.bf16.mxu0 %v1869_v3  ;;  %v1877_v8 = vld [vmem:[#allocation5 + $0x30] ss:$8 sps:$4 sm:$0xff]   ;;  %v1878_v9 = vld [vmem:[#allocation5 + $0x44] ss:$8 sps:$4 sm:$0xff]   ;;  %v1880_v10 = vld [vmem:[#allocation5 + $0x40] ss:$8 sps:$4 sm:$0xff]  }
  0x7c   : > { %v1881_v11 = vld [vmem:[#allocation5 + $0x54] ss:$8 sps:$4 sm:$0xff]   ;;  %v1883_v12 = vld [vmem:[#allocation5 + $0x50] ss:$8 sps:$4 sm:$0xff]   ;;  %v1884_v13 = vld [vmem:[#allocation5 + $0x64] ss:$8 sps:$4 sm:$0xff]  }
  0x7d   : > { %v1886_v14 = vld [vmem:[#allocation5 + $0x60] ss:$8 sps:$4 sm:$0xff]   ;;  %v1887_v15 = vld [vmem:[#allocation5 + $0x74] ss:$8 sps:$4 sm:$0xff]   ;;  %v1889_v16 = vld [vmem:[#allocation5 + $0x70] ss:$8 sps:$4 sm:$0xff]  }
  0x7e   : > { %509 = vmatpush1.bf16.msra.mxu0 %v1871_v4  ;;  %v1890_v17 = vld [vmem:[%s2317_s18] sm:$0xff]   ;;  %v1891_v18 = vld [vmem:[%s2317_s18 + $0x8] sm:$0xff]   ;;  %v1893_v20 = vld [vmem:[%s2317_s18 + $0x18] sm:$0xff]   ;;  %v369_v26 = vshrl.u32 %v368_v25, 7  ;;  %vm765_vm0 = vcmask 523264   ;;  %s2467_s6 = scalar_lea.vmem [#allocation8], %s1495_s29 }
  0x7f   : > { %510 = vmatprep.subr.bf16.mxu0 %v1872_v5  ;;  %v1894_v21 = vld [vmem:[%s2317_s18 + $0x20] sm:$0xff]   ;;  %v1895_v22 = vld [vmem:[%s2317_s18 + $0x28] sm:$0xff]   ;;  %v1896_v23 = vld [vmem:[%s2317_s18 + $0x30] sm:$0xff]   ;;  %s1321_s16 = scalar_lea.sflag [#allocation4], %s2311_s13 }
  0x80   : > { %v1897_v24 = vld [vmem:[%s2317_s18 + $0x38] sm:$0xff]   ;;  %v370_v27 = vsub.s32 0, %v369_v26  ;;  %v366_v28 = vld [vmem:[%s2528_s2] sm:$0x3]  ;;  %v374_v29 = vsub.s32 1, %v369_v26 }
  0x82   : > { %511 = vmatpush1.bf16.msra.mxu0 %v1874_v6  ;;  %v2338_v30 = vrot.slane %v366_v28, %v370_v27  ;;  %v2340_v32 = vrot.slane %v366_v28, %v374_v29 }
  0x83   : > { %512 = vmatprep.subr.bf16.mxu0 %v1875_v7 }
  0x86   : > { %513 = vmatpush1.bf16.msra.mxu0 %v1877_v8 }
  0x87   : > { %514 = vmatprep.subr.bf16.mxu0 %v1878_v9 }
  0x8a   : > { %515 = vmatpush1.bf16.msra.mxu0 %v1880_v10 }
  0x8b   : > { %516 = vmatprep.subr.bf16.mxu0 %v1881_v11 }
  0x8e   : > { %517 = vmatpush1.bf16.msra.mxu0 %v1883_v12 }
  0x8f   : > { %518 = vmatprep.subr.bf16.mxu0 %v1884_v13 }
  0x92   : > { %519 = vmatpush1.bf16.msra.mxu0 %v1886_v14 }
  0x93   : > { %520 = vmatprep.subr.bf16.mxu0 %v1887_v15 }
  0x96   : > { %521 = vmatpush1.bf16.msra.mxu0 %v1889_v16 }
  0x99   : > { %539 = vmatmul.mubr.bf16.vlgmr.msra.gmra.mrb[0].mxu0 %v1890_v17 }
  0x9a   : > { %548 = vmatprep.mubr.bf16.mxu0 %v2099_v0 }
  0xa1   : > { %549 = vmatmul.mubr.bf16.gmra.mrb[4].mxu0 %v1891_v18 }
  0xa2   : > { %558 = vmatprep.mubr.bf16.mxu0 %v2099_v0 }
  0xa9   : > { %559 = vmatmul.mubr.bf16.gmra.mrb[8].mxu0 %v1892_v19 }
  0xaa   : > { %568 = vmatprep.mubr.bf16.mxu0 %v2099_v0 }
  0xb1   : > { %569 = vmatmul.mubr.bf16.gmra.mrb[12].mxu0 %v1893_v20 }
  0xb2   : > { %578 = vmatprep.mubr.bf16.mxu0 %v2099_v0 }
  0xb9   : > { %579 = vmatmul.mubr.bf16.gmra.mrb[16].mxu0 %v1894_v21 }
  0xba   : > { %588 = vmatprep.mubr.bf16.mxu0 %v2099_v0 }
  0xc1   : > { %589 = vmatmul.mubr.bf16.gmra.mrb[20].mxu0 %v1895_v22 }
  0xc2   : > { %598 = vmatprep.mubr.bf16.mxu0 %v2099_v0 }
  0xc9   : > { %599 = vmatmul.mubr.bf16.gmra.mrb[24].mxu0 %v1896_v23 }
  0xca   : > { %608 = vmatprep.mubr.bf16.mxu0 %v2099_v0 }
  0xd1   : > { %609 = vmatmul.mubr.bf16.gmra.mrb[28].mxu0 %v1897_v24 }
 0x16c   : > { %v540_v31 = vpop.f32.mrb[0].mxu0 }
 0x16d   : > { %v542_v33 = vpop.f32.mrb[1].mxu0  ;;  %v541_v35 = vadd.f32 %v540_v31, %v2338_v30 }
 0x16e   : > { %v544_v34 = vpop.f32.mrb[2].mxu0  ;;  %v543_v38 = vadd.f32 %v542_v33, %v2340_v32 }
 0x16f   : > { %v545_v36 = vadd.f32 %v544_v34, %v2338_v30  ;;  %v546_v37 = vpop.f32.mrb[3].mxu0 }
 0x170   : > { %v547_v39 = vadd.f32 %v546_v37, %v2340_v32 }
 0x171   : > { %v619_v40 = vpack.c.bf16 %v545_v36, %v541_v35 }
 0x172   : > { %v2346_v41 = vpack.c.bf16 %v547_v39, %v543_v38 }
 0x173   : > { %1643 = vmatprep.subr.bf16.mxu0 %v619_v40  ;;  %1651 = vmatprep.mubr.bf16.mxu0 %v619_v40 }
 0x174   : > { %v550_v42 = vpop.f32.mrb[4].mxu0  ;;  %1644 = vmatpush3.bf16.xpose.msra.mxu0 %v619_v40 }
 0x175   : > { %v552_v43 = vpop.f32.mrb[5].mxu0  ;;  %v551_v45 = vadd.f32 %v550_v42, %v2338_v30 }
 0x176   : > { %v554_v44 = vpop.f32.mrb[6].mxu0  ;;  %v553_v48 = vadd.f32 %v552_v43, %v2340_v32 }
 0x177   : > { %v555_v46 = vadd.f32 %v554_v44, %v2338_v30  ;;  %v556_v47 = vpop.f32.mrb[7].mxu0 }
 0x178   : > { %v557_v49 = vadd.f32 %v556_v47, %v2340_v32 }
 0x179   : > { %v621_v50 = vpack.c.bf16 %v555_v46, %v551_v45 }
 0x17a   : > { %v2352_v51 = vpack.c.bf16 %v557_v49, %v553_v48 }
 0x17b   : > { %1645 = vmatprep.subr.bf16.mxu0 %v621_v50 }
 0x17c   : > { %v560_v52 = vpop.f32.mrb[8].mxu0  ;;  %1646 = vmatpush3.bf16.xpose.msra.mxu0 %v621_v50 }
 0x17d   : > { %v562_v53 = vpop.f32.mrb[9].mxu0  ;;  %v561_v55 = vadd.f32 %v560_v52, %v2338_v30 }
 0x17e   : > { %v564_v54 = vpop.f32.mrb[10].mxu0  ;;  %v563_v58 = vadd.f32 %v562_v53, %v2340_v32 }
 0x17f   : > { %v565_v56 = vadd.f32 %v564_v54, %v2338_v30  ;;  %v566_v57 = vpop.f32.mrb[11].mxu0 }
 0x180   : > { %v567_v59 = vadd.f32 %v566_v57, %v2340_v32 }
 0x181   : > { %v623_v60 = vpack.c.bf16 %v565_v56, %v561_v55 }
 0x182   : > { %v2358_v61 = vpack.c.bf16 %v567_v59, %v563_v58 }
 0x183   : > { %1647 = vmatprep.subr.bf16.mxu0 %v623_v60 }
 0x184   : > { %v570_v62 = vpop.f32.mrb[12].mxu0  ;;  %1648 = vmatpush3.bf16.xpose.msra.mxu0 %v623_v60 }
 0x185   : > { %v572_v63 = vpop.f32.mrb[13].mxu0  ;;  %v571_v1 = vadd.f32 %v570_v62, %v2338_v30 }
 0x186   : > { %v574_v0 = vpop.f32.mrb[14].mxu0  ;;  %v573_v4 = vadd.f32 %v572_v63, %v2340_v32 }
 0x187   : > { %v575_v2 = vadd.f32 %v574_v0, %v2338_v30  ;;  %v576_v3 = vpop.f32.mrb[15].mxu0 }
 0x188   : > { %v577_v5 = vadd.f32 %v576_v3, %v2340_v32 }
 0x189   : > { %v625_v6 = vpack.c.bf16 %v575_v2, %v571_v1 }
 0x18a   : > { %v2364_v7 = vpack.c.bf16 %v577_v5, %v573_v4 }
 0x18b   : > { %1649 = vmatprep.subr.bf16.mxu0 %v625_v6 }
 0x18c   : > { %v580_v8 = vpop.f32.mrb[16].mxu0  ;;  %1650 = vmatpush3.bf16.xpose.msra.mxu0 %v625_v6 }
 0x18d   : > { %v582_v9 = vpop.f32.mrb[17].mxu0  ;;  %v581_v11 = vadd.f32 %v580_v8, %v2338_v30 }
 0x18e   : > { %v584_v10 = vpop.f32.mrb[18].mxu0  ;;  %v583_v14 = vadd.f32 %v582_v9, %v2340_v32 }
 0x18f   : > { %v585_v12 = vadd.f32 %v584_v10, %v2338_v30  ;;  %v586_v13 = vpop.f32.mrb[19].mxu0 }
 0x190   : > { %v587_v15 = vadd.f32 %v586_v13, %v2340_v32 }
 0x191   : > { %v627_v16 = vpack.c.bf16 %v585_v12, %v581_v11 }
 0x192   : > { %v628_v17 = vpack.c.bf16 %v587_v15, %v583_v14 }
 0x193   : > { %1652 = vmatmul.mubr.bf16.vlgmr.msra.gmra.mrb[32].mxu0 %v621_v50  ;;  %1659 = vmatprep.subr.bf16.mxu1 %v627_v16 }
 0x194   : > { %v590_v18 = vpop.f32.mrb[20].mxu0  ;;  %1655 = vmatprep.mubr.bf16.mxu0 %v623_v60  ;;  %1660 = vmatpush3.bf16.xpose.msra.mxu1 %v627_v16 }
 0x195   : > { %v592_v19 = vpop.f32.mrb[21].mxu0  ;;  %1691 = vmatprep.subr.bf16.mxu0 %v628_v17  ;;  %1667 = vmatprep.mubr.bf16.mxu1 %v627_v16  ;;  %v591_v21 = vadd.f32 %v590_v18, %v2338_v30 }
 0x196   : > { %v594_v20 = vpop.f32.mrb[22].mxu0  ;;  %1692 = vmatpush3.bf16.msra.mxu0 %v628_v17  ;;  %v593_v24 = vadd.f32 %v592_v19, %v2340_v32 }
 0x197   : > { %v595_v22 = vadd.f32 %v594_v20, %v2338_v30  ;;  %v596_v23 = vpop.f32.mrb[23].mxu0 }
 0x198   : > { %v597_v25 = vadd.f32 %v596_v23, %v2340_v32 }
 0x199   : > { %v629_v26 = vpack.c.bf16 %v595_v22, %v591_v21 }
 0x19a   : > { %v630_v27 = vpack.c.bf16 %v597_v25, %v593_v24 }
 0x19b   : > { %1656 = vmatmul.mubr.bf16.gmra.mrb[36].mxu0 %v625_v6  ;;  %1661 = vmatprep.subr.bf16.mxu1 %v629_v26 }
 0x19c   : > { %v600_v28 = vpop.f32.mrb[24].mxu0  ;;  %1662 = vmatpush3.bf16.xpose.msra.mxu1 %v629_v26  ;;  %1693 = vmatprep.subr.bf16.mxu0 %v630_v27 }
 0x19d   : > { %v602_v29 = vpop.f32.mrb[25].mxu0  ;;  %1694 = vmatpush3.bf16.msra.mxu0 %v630_v27  ;;  %v601_v33 = vadd.f32 %v600_v28, %v2338_v30 }
 0x19e   : > { %v604_v31 = vpop.f32.mrb[26].mxu0  ;;  %v603_v36 = vadd.f32 %v602_v29, %v2340_v32 }
 0x19f   : > { %v605_v34 = vadd.f32 %v604_v31, %v2338_v30  ;;  %v606_v35 = vpop.f32.mrb[27].mxu0 }
 0x1a0   : > { %v607_v37 = vadd.f32 %v606_v35, %v2340_v32 }
 0x1a1   : > { %v631_v38 = vpack.c.bf16 %v605_v34, %v601_v33 }
 0x1a2   : > { %v632_v39 = vpack.c.bf16 %v607_v37, %v603_v36 }
 0x1a3   : > { %1663 = vmatprep.subr.bf16.mxu1 %v631_v38 }
 0x1a4   : > { %v610_v40 = vpop.f32.mrb[28].mxu0  ;;  %1664 = vmatpush3.bf16.xpose.msra.mxu1 %v631_v38  ;;  %1695 = vmatprep.subr.bf16.mxu0 %v632_v39 }
 0x1a5   : > { %v612_v42 = vpop.f32.mrb[29].mxu0  ;;  %1696 = vmatpush3.bf16.msra.mxu0 %v632_v39  ;;  %v611_v44 = vadd.f32 %v610_v40, %v2338_v30 }
 0x1a6   : > { %v614_v43 = vpop.f32.mrb[30].mxu0  ;;  %v613_v47 = vadd.f32 %v612_v42, %v2340_v32 }
 0x1a7   : > { %v615_v45 = vadd.f32 %v614_v43, %v2338_v30  ;;  %v616_v46 = vpop.f32.mrb[31].mxu0 }
 0x1a8   : > { %v617_v48 = vadd.f32 %v616_v46, %v2340_v32 }
 0x1a9   : > { %v633_v49 = vpack.c.bf16 %v615_v45, %v611_v44 }
 0x1aa   : > { %v634_v50 = vpack.c.bf16 %v617_v48, %v613_v47 }
 0x1ab   : > { %1665 = vmatprep.subr.bf16.mxu1 %v633_v49 }
 0x1ac   : > { %1666 = vmatpush3.bf16.xpose.msra.mxu1 %v633_v49  ;;  %1697 = vmatprep.subr.bf16.mxu0 %v634_v50 }
 0x1ad   : > { %1675 = vmatprep.subr.bf16.mxu1 %v2346_v41  ;;  %1698 = vmatpush3.bf16.msra.mxu0 %v634_v50 }
 0x1b3   : > { %1668 = vmatmul.mubr.bf16.vlgmr.msra.gmra.mrb[0].mxu1 %v629_v26 }
 0x1b4   : > { %1671 = vmatprep.mubr.bf16.mxu1 %v631_v38  ;;  %1676 = vmatpush3.bf16.msra.mxu1 %v2346_v41 }
 0x1b5   : > { %1677 = vmatprep.subr.bf16.mxu1 %v2352_v51 }
 0x1b8   : > { %1678 = vmatpush3.bf16.msra.mxu1 %v2352_v51 }
 0x1b9   : > { %1679 = vmatprep.subr.bf16.mxu1 %v2358_v61 }
 0x1bb   : > { %1672 = vmatmul.mubr.bf16.gmra.mrb[4].mxu1 %v633_v49 }
 0x1bc   : > { %1680 = vmatpush3.bf16.msra.mxu1 %v2358_v61 }
 0x1bd   : > { %1681 = vmatprep.subr.bf16.mxu1 %v2364_v7 }
 0x1c0   : > { %1682 = vmatpush3.bf16.msra.mxu1 %v2364_v7 }
 0x266   : > { %v1653_v30 = vpop.f32.mrb[32].mxu0 }
 0x267   : > { %v669_v32 = vpop.f32.mrb[33].mxu0  ;;  %v772_v52 = vsel %vm765_vm0, %v1653_v30, -inf }
 0x268   : > { %773 = vmax.xlane.f32.xlu1 %v772_v52  ;;  %v1654_v41 = vpop.f32.mrb[34].mxu0  ;;  %v766_v53 = vsel %vm765_vm0, %v669_v32, -inf }
 0x269   : > { %767 = vmax.xlane.f32.xlu0 %v766_v53  ;;  %v672_v51 = vpop.f32.mrb[35].mxu0  ;;  %v775_v54 = vsel %vm765_vm0, %v1654_v41, -inf }
 0x26a   : > { %v769_v55 = vsel %vm765_vm0, %v672_v51, -inf }
 0x26c   : > { %776 = vmax.xlane.f32.xlu1 %v775_v54 }
 0x26d   : > { %770 = vmax.xlane.f32.xlu0 %v769_v55 }
 0x26e   : > { %v1657_v56 = vpop.f32.mrb[36].mxu0 }
 0x26f   : > { %v685_v57 = vpop.f32.mrb[37].mxu0  ;;  %v784_v62 = vsel %vm765_vm0, %v1657_v56, -inf }
 0x270   : > { %v1658_v58 = vpop.f32.mrb[38].mxu0  ;;  %v778_v59 = vsel %vm765_vm0, %v685_v57, -inf }
 0x271   : > { %779 = vmax.xlane.f32.xlu0 %v778_v59  ;;  %v688_v60 = vpop.f32.mrb[39].mxu0  ;;  %v787_v63 = vsel %vm765_vm0, %v1658_v58, -inf }
 0x272   : > { %v781_v61 = vsel %vm765_vm0, %v688_v60, -inf }
 0x273   : > { %782 = vmax.xlane.f32.xlu1 %v781_v61 }
 0x275   : > { %785 = vmax.xlane.f32.xlu0 %v784_v62 }
 0x277   : > { %788 = vmax.xlane.f32.xlu1 %v787_v63 }
 0x286   : > { %v2398_v0 = vpop.f32.mrb[0].mxu1 }
 0x287   : > { %v2400_v1 = vpop.f32.mrb[1].mxu1  ;;  %v796_v6 = vsel %vm765_vm0, %v2398_v0, -inf }
 0x288   : > { %v2402_v2 = vpop.f32.mrb[2].mxu1  ;;  %v790_v3 = vsel %vm765_vm0, %v2400_v1, -inf }
 0x289   : > { %v2406_v4 = vpop.f32.mrb[3].mxu1  ;;  %791 = vmax.xlane.f32.xlu0 %v790_v3  ;;  %v799_v8 = vsel %vm765_vm0, %v2402_v2, -inf }
 0x28a   : > { %v793_v5 = vsel %vm765_vm0, %v2406_v4, -inf }
 0x28b   : > { %794 = vmax.xlane.f32.xlu1 %v793_v5 }
 0x28d   : > { %797 = vmax.xlane.f32.xlu0 %v796_v6 }
 0x28e   : > { %v2412_v7 = vpop.f32.mrb[4].mxu1 }
 0x28f   : > { %v2416_v9 = vpop.f32.mrb[5].mxu1  ;;  %800 = vmax.xlane.f32.xlu1 %v799_v8  ;;  %v808_v14 = vsel %vm765_vm0, %v2412_v7, -inf }
 0x290   : > { %v2418_v10 = vpop.f32.mrb[6].mxu1  ;;  %v802_v11 = vsel %vm765_vm0, %v2416_v9, -inf }
 0x291   : > { %v2422_v12 = vpop.f32.mrb[7].mxu1  ;;  %803 = vmax.xlane.f32.xlu0 %v802_v11  ;;  %v811_v15 = vsel %vm765_vm0, %v2418_v10, -inf }
 0x292   : > { %v805_v13 = vsel %vm765_vm0, %v2422_v12, -inf }
 0x293   : > { %806 = vmax.xlane.f32.xlu1 %v805_v13 }
 0x295   : > { %809 = vmax.xlane.f32.xlu0 %v808_v14 }
 0x297   : > { %812 = vmax.xlane.f32.xlu1 %v811_v15 }
 0x2f5   : > { %v774_v16 = vpop.xlane.xlu1 %773 }
 0x2f6   : > { %v768_v17 = vpop.xlane.xlu0 %767  ;;  %v816_v19 = vsub.f32 %v1653_v30, %v774_v16 }
 0x2f7   : > { %v814_v22 = vsub.f32 %v669_v32, %v768_v17 }
 0x2f9   : > { %v777_v18 = vpop.xlane.xlu1 %776 }
 0x2fa   : > { %v817_v20 = vsub.f32 %v1654_v41, %v777_v18  ;;  %v771_v21 = vpop.xlane.xlu0 %770 }
 0x2fb   : > { %v815_v23 = vsub.f32 %v672_v51, %v771_v21 }
 0x2fc   : > { %v831_v24 = vpack.c.bf16 %v817_v20, %v816_v19 }
 0x2fd   : > { %v830_v25 = vpack.c.bf16 %v815_v23, %v814_v22 }
 0x2fe   : > { %v842_v26 = vmul.bf16 1069105081, %v831_v24  ;;  %v780_v27 = vpop.xlane.xlu0 %779 }
 0x2ff   : > { %v839_v28 = vmul.bf16 1069105081, %v830_v25  ;;  %v818_v31 = vsub.f32 %v685_v57, %v780_v27 }
 0x300   : > { %1906 = vpow.bf16 %v842_v26  ;;  %v783_v29 = vpop.xlane.xlu1 %782 }
 0x301   : > { %1908 = vpow.bf16 %v839_v28  ;;  %v819_v33 = vsub.f32 %v688_v60, %v783_v29 }
 0x302   : > { %v786_v34 = vpop.xlane.xlu0 %785 }
 0x303   : > { %v832_v35 = vpack.c.bf16 %v819_v33, %v818_v31  ;;  %v820_v38 = vsub.f32 %v1657_v56, %v786_v34 }
 0x304   : > { %v789_v36 = vpop.xlane.xlu1 %788 }
 0x305   : > { %v845_v37 = vmul.bf16 1069105081, %v832_v35  ;;  %v821_v39 = vsub.f32 %v1658_v58, %v789_v36 }
 0x307   : > { %1910 = vpow.bf16 %v845_v37  ;;  %v833_v40 = vpack.c.bf16 %v821_v39, %v820_v38 }
 0x309   : > { %v848_v42 = vmul.bf16 1069105081, %v833_v40 }
 0x30b   : > { %v1907_v43 = vpop.eup %1906  ;;  %1912 = vpow.bf16 %v848_v42 }
 0x30c   : > { %v1909_v44 = vpop.eup %1908  ;;  %v864_v49 = vunpack.c.l.bf16 %v1907_v43  ;;  %v865_v50 = vunpack.c.h.bf16 %v1907_v43 }
 0x30d   : > { %1683 = vmatprep.mubr.msk.bf16.mxu1 %vm765_vm0, %v1909_v44  ;;  %v862_v45 = vunpack.c.l.bf16 %v1909_v44  ;;  %v863_v46 = vunpack.c.h.bf16 %v1909_v44  ;;  %v1899_v44 = vld [vmem:[#allocation7 + $0x8] sm:$0xff]  }
 0x30e   : > { %1684 = vmatmul.mubr.msk.bf16.vlgmr.msra.gmra.mrb[8].mxu1 %vm765_vm0, %v1907_v43  ;;  %v884_v32 = vsel %vm765_vm0, %v864_v49, 0.0  ;;  %v887_v52 = vsel %vm765_vm0, %v865_v50, 0.0  ;;  %v1898_v43 = vld [vmem:[#allocation7] sm:$0xff]   ;;  %v1904_v49 = vld [vmem:[#allocation7 + $0x30] sm:$0xff]   ;;  %v1905_v50 = vld [vmem:[#allocation7 + $0x38] sm:$0xff]  }
 0x30f   : > { %v878_v47 = vsel %vm765_vm0, %v862_v45, 0.0  ;;  %v881_v48 = vsel %vm765_vm0, %v863_v46, 0.0  ;;  %1707 = vmatprep.subr.bf16.mxu1 %v1898_v43  ;;  %v1900_v45 = vld [vmem:[#allocation7 + $0x10] sm:$0xff]   ;;  %v1901_v46 = vld [vmem:[#allocation7 + $0x18] sm:$0xff]  }
 0x310   : > { %879 = vadd.xlane.f32.xlu0 %v878_v47  ;;  %882 = vadd.xlane.f32.xlu1 %v881_v48  ;;  %v1902_v47 = vld [vmem:[#allocation7 + $0x20] sm:$0xff]   ;;  %v1903_v48 = vld [vmem:[#allocation7 + $0x28] sm:$0xff]  }
 0x311   : > { %1708 = vmatpush3.bf16.msra.mxu1 %v1898_v43 }
 0x312   : > { %v1911_v30 = vpop.eup %1910  ;;  %1709 = vmatprep.subr.bf16.mxu1 %v1899_v44 }
 0x313   : > { %1687 = vmatprep.mubr.msk.bf16.mxu1 %vm765_vm0, %v1911_v30  ;;  %v867_v41 = vunpack.c.h.bf16 %v1911_v30  ;;  %v866_v53 = vunpack.c.l.bf16 %v1911_v30 }
 0x314   : > { %885 = vadd.xlane.f32.xlu0 %v884_v32  ;;  %888 = vadd.xlane.f32.xlu1 %v887_v52 }
 0x315   : > { %v893_v55 = vsel %vm765_vm0, %v867_v41, 0.0  ;;  %v890_v56 = vsel %vm765_vm0, %v866_v53, 0.0  ;;  %1710 = vmatpush3.bf16.msra.mxu1 %v1899_v44 }
 0x316   : > { %v1913_v51 = vpop.eup %1912  ;;  %v792_v54 = vpop.xlane.xlu0 %791  ;;  %1711 = vmatprep.subr.bf16.mxu1 %v1900_v45 }
 0x317   : > { %1688 = vmatmul.mubr.msk.bf16.gmra.mrb[12].mxu1 %vm765_vm0, %v1913_v51  ;;  %v869_v57 = vunpack.c.h.bf16 %v1913_v51  ;;  %v868_v58 = vunpack.c.l.bf16 %v1913_v51  ;;  %v822_v60 = vsub.f32 %v2400_v1, %v792_v54 }
 0x318   : > { %894 = vadd.xlane.f32.xlu1 %v893_v55  ;;  %891 = vadd.xlane.f32.xlu0 %v890_v56  ;;  %v795_v59 = vpop.xlane.xlu1 %794 }
 0x319   : > { %v823_v61 = vsub.f32 %v2406_v4, %v795_v59  ;;  %v899_v3 = vsel %vm765_vm0, %v869_v57, 0.0  ;;  %v896_v5 = vsel %vm765_vm0, %v868_v58, 0.0  ;;  %1712 = vmatpush3.bf16.msra.mxu1 %v1900_v45 }
 0x31a   : > { %v798_v62 = vpop.xlane.xlu0 %797  ;;  %1713 = vmatprep.subr.bf16.mxu1 %v1901_v46 }
 0x31b   : > { %v834_v63 = vpack.c.bf16 %v823_v61, %v822_v60  ;;  %v824_v11 = vsub.f32 %v2398_v0, %v798_v62 }
 0x31c   : > { %900 = vadd.xlane.f32.xlu1 %v899_v3  ;;  %897 = vadd.xlane.f32.xlu0 %v896_v5  ;;  %v801_v6 = vpop.xlane.xlu1 %800 }
 0x31d   : > { %v851_v8 = vmul.bf16 1069105081, %v834_v63  ;;  %v825_v13 = vsub.f32 %v2402_v2, %v801_v6  ;;  %1714 = vmatpush3.bf16.msra.mxu1 %v1901_v46 }
 0x31e   : > { %v804_v14 = vpop.xlane.xlu0 %803  ;;  %1715 = vmatprep.subr.bf16.mxu1 %v1902_v47 }
 0x31f   : > { %1914 = vpow.bf16 %v851_v8  ;;  %v835_v15 = vpack.c.bf16 %v825_v13, %v824_v11  ;;  %v826_v4 = vsub.f32 %v2416_v9, %v804_v14 }
 0x320   : > { %v807_v1 = vpop.xlane.xlu1 %806 }
 0x321   : > { %v854_v16 = vmul.bf16 1069105081, %v835_v15  ;;  %v827_v17 = vsub.f32 %v2422_v12, %v807_v1  ;;  %1716 = vmatpush3.bf16.msra.mxu1 %v1902_v47 }
 0x322   : > { %v810_v18 = vpop.xlane.xlu0 %809  ;;  %1717 = vmatprep.subr.bf16.mxu1 %v1903_v48 }
 0x323   : > { %1916 = vpow.bf16 %v854_v16  ;;  %v836_v19 = vpack.c.bf16 %v827_v17, %v826_v4  ;;  %v828_v22 = vsub.f32 %v2412_v7, %v810_v18 }
 0x324   : > { %v813_v20 = vpop.xlane.xlu1 %812 }
 0x325   : > { %v857_v21 = vmul.bf16 1069105081, %v836_v19  ;;  %v829_v0 = vsub.f32 %v2418_v10, %v813_v20  ;;  %1718 = vmatpush3.bf16.msra.mxu1 %v1903_v48 }
 0x326   : > { %1719 = vmatprep.subr.bf16.mxu1 %v1904_v49 }
 0x327   : > { %1918 = vpow.bf16 %v857_v21  ;;  %v837_v2 = vpack.c.bf16 %v829_v0, %v828_v22 }
 0x329   : > { %v860_v23 = vmul.bf16 1069105081, %v837_v2  ;;  %1720 = vmatpush3.bf16.msra.mxu1 %v1904_v49 }
 0x32a   : > { %v1915_v24 = vpop.eup %1914  ;;  %1721 = vmatprep.subr.bf16.mxu1 %v1905_v50 }
 0x32b   : > { %1920 = vpow.bf16 %v860_v23  ;;  %1699 = vmatprep.mubr.msk.bf16.mxu0 %vm765_vm0, %v1915_v24  ;;  %v871_v25 = vunpack.c.h.bf16 %v1915_v24  ;;  %v870_v9 = vunpack.c.l.bf16 %v1915_v24 }
 0x32d   : > { %v905_v12 = vsel %vm765_vm0, %v871_v25, 0.0  ;;  %v902_v26 = vsel %vm765_vm0, %v870_v9, 0.0  ;;  %1722 = vmatpush3.bf16.msra.mxu1 %v1905_v50 }
 0x32e   : > { %v1917_v27 = vpop.eup %1916  ;;  %906 = vadd.xlane.f32.xlu1 %v905_v12  ;;  %903 = vadd.xlane.f32.xlu0 %v902_v26 }
 0x32f   : > { %1700 = vmatmul.mubr.msk.bf16.vlgmr.msra.gmra.mrb[40].mxu0 %vm765_vm0, %v1917_v27  ;;  %v873_v7 = vunpack.c.h.bf16 %v1917_v27  ;;  %v872_v10 = vunpack.c.l.bf16 %v1917_v27 }
 0x331   : > { %v911_v28 = vsel %vm765_vm0, %v873_v7, 0.0  ;;  %v908_v29 = vsel %vm765_vm0, %v872_v10, 0.0 }
 0x332   : > { %v1919_v31 = vpop.eup %1918  ;;  %912 = vadd.xlane.f32.xlu1 %v911_v28  ;;  %909 = vadd.xlane.f32.xlu0 %v908_v29 }
 0x333   : > { %1703 = vmatprep.mubr.msk.bf16.mxu0 %vm765_vm0, %v1919_v31  ;;  %v875_v33 = vunpack.c.h.bf16 %v1919_v31  ;;  %v874_v34 = vunpack.c.l.bf16 %v1919_v31 }
 0x335   : > { %v917_v35 = vsel %vm765_vm0, %v875_v33, 0.0  ;;  %v914_v36 = vsel %vm765_vm0, %v874_v34, 0.0 }
 0x336   : > { %v1921_v37 = vpop.eup %1920  ;;  %918 = vadd.xlane.f32.xlu1 %v917_v35  ;;  %915 = vadd.xlane.f32.xlu0 %v914_v36 }
 0x337   : > { %1704 = vmatmul.mubr.msk.bf16.gmra.mrb[44].mxu0 %vm765_vm0, %v1921_v37  ;;  %v877_v38 = vunpack.c.h.bf16 %v1921_v37  ;;  %v876_v39 = vunpack.c.l.bf16 %v1921_v37 }
 0x339   : > { %v923_v40 = vsel %vm765_vm0, %v877_v38, 0.0  ;;  %v920_v42 = vsel %vm765_vm0, %v876_v39, 0.0 }
 0x33a   : > { %924 = vadd.xlane.f32.xlu1 %v923_v40  ;;  %921 = vadd.xlane.f32.xlu0 %v920_v42 }
 0x39d   : > { %v880_v30 = vpop.xlane.xlu0 %879  ;;  %v883_v32 = vpop.xlane.xlu1 %882 }
 0x39e   : > { %1922 = vrcp.f32 %v880_v30 }
 0x3a1   : > { %v886_v52 = vpop.xlane.xlu0 %885  ;;  %v889_v41 = vpop.xlane.xlu1 %888 }
 0x3a2   : > { %1924 = vrcp.f32 %v886_v52 }
 0x3a3   : > { %1926 = vrcp.f32 %v889_v41 }
 0x3a4   : > { %1928 = vrcp.f32 %v883_v32 }
 0x3a5   : > { %v892_v53 = vpop.xlane.xlu0 %891  ;;  %v895_v51 = vpop.xlane.xlu1 %894 }
 0x3a6   : > { %1930 = vrcp.f32 %v892_v53 }
 0x3a8   : > { %v1923_v56 = vpop.eup %1922 }
 0x3a9   : > { %v898_v54 = vpop.xlane.xlu0 %897  ;;  %v901_v55 = vpop.xlane.xlu1 %900 }
 0x3aa   : > { %1932 = vrcp.f32 %v898_v54 }
 0x3ab   : > { %1934 = vrcp.f32 %v901_v55 }
 0x3ac   : > { %v1925_v58 = vpop.eup %1924  ;;  %1936 = vrcp.f32 %v895_v51 }
 0x3ad   : > { %v1927_v60 = vpop.eup %1926 }
 0x3ae   : > { %v1929_v62 = vpop.eup %1928 }
 0x3b0   : > { %v1931_v14 = vpop.eup %1930 }
 0x3b4   : > { %v1933_v1 = vpop.eup %1932 }
 0x3b5   : > { %v1935_v4 = vpop.eup %1934 }
 0x3b6   : > { %v1937_v19 = vpop.eup %1936 }
 0x3bb   : > { %v904_v17 = vpop.xlane.xlu0 %903  ;;  %v907_v20 = vpop.xlane.xlu1 %906 }
 0x3bc   : > { %1938 = vrcp.f32 %v904_v17 }
 0x3bf   : > { %v910_v9 = vpop.xlane.xlu0 %909  ;;  %v913_v12 = vpop.xlane.xlu1 %912 }
 0x3c0   : > { %1940 = vrcp.f32 %v910_v9 }
 0x3c1   : > { %1942 = vrcp.f32 %v913_v12 }
 0x3c2   : > { %1944 = vrcp.f32 %v907_v20 }
 0x3c3   : > { %v916_v26 = vpop.xlane.xlu0 %915  ;;  %v919_v27 = vpop.xlane.xlu1 %918 }
 0x3c4   : > { %1946 = vrcp.f32 %v916_v26 }
 0x3c6   : > { %v1939_v28 = vpop.eup %1938 }
 0x3c7   : > { %v922_v7 = vpop.xlane.xlu0 %921  ;;  %v925_v10 = vpop.xlane.xlu1 %924 }
 0x3c8   : > { %1948 = vrcp.f32 %v922_v7 }
 0x3c9   : > { %1950 = vrcp.f32 %v925_v10 }
 0x3ca   : > { %v1941_v31 = vpop.eup %1940  ;;  %1952 = vrcp.f32 %v919_v27 }
 0x3cb   : > { %v1943_v34 = vpop.eup %1942 }
 0x3cc   : > { %v1945_v36 = vpop.eup %1944 }
 0x3ce   : > { %v1947_v45 = vpop.eup %1946 }
 0x3d2   : > { %v1949_v47 = vpop.eup %1948 }
 0x3d3   : > { %v1951_v49 = vpop.eup %1950 }
 0x3d4   : > { %v1953_v30 = vpop.eup %1952 }
 0x3e1   : > { %v1685_v57 = vpop.f32.mrb[8].mxu1 }
 0x3e2   : > { %v972_v59 = vpop.f32.mrb[9].mxu1  ;;  %v1098_v63 = vmul.f32 %v1925_v58, %v1685_v57  ;;  %v1531_v57 = vld [vmem:[%s2530_s4] ss:$0 sm:$0xff] }
 0x3e3   : > { %v1686_v61 = vpop.f32.mrb[10].mxu1  ;;  %v1096_v6 = vmul.f32 %v1923_v56, %v972_v59 }
 0x3e4   : > { %v1099_v3 = vmul.f32 %v1927_v60, %v1686_v61  ;;  %v975_v5 = vpop.f32.mrb[11].mxu1 }
 0x3e5   : > { %v1097_v8 = vmul.f32 %v1929_v62, %v975_v5 }
 0x3e6   : > { %v1113_v11 = vpack.c.bf16 %v1099_v3, %v1098_v63 }
 0x3e7   : > { %v1112_v13 = vpack.c.bf16 %v1097_v8, %v1096_v6 }
 0x3e9   : > { %1723 = vmatprep.mubr.bf16.mxu1 %v1112_v13 }
 0x3ea   : > { %v1689_v15 = vpop.f32.mrb[12].mxu1  ;;  %1724 = vmatmul.mubr.bf16.vlgmr.msra.gmra.mrb[16].mxu1 %v1113_v11 }
 0x3eb   : > { %v988_v16 = vpop.f32.mrb[13].mxu1  ;;  %v1102_v21 = vmul.f32 %v1933_v1, %v1689_v15 }
 0x3ec   : > { %v1690_v18 = vpop.f32.mrb[14].mxu1  ;;  %v1100_v2 = vmul.f32 %v1931_v14, %v988_v16 }
 0x3ed   : > { %v1103_v22 = vmul.f32 %v1935_v4, %v1690_v18  ;;  %v991_v0 = vpop.f32.mrb[15].mxu1 }
 0x3ee   : > { %v1101_v23 = vmul.f32 %v1937_v19, %v991_v0 }
 0x3ef   : > { %v1115_v24 = vpack.c.bf16 %v1103_v22, %v1102_v21 }
 0x3f0   : > { %v1114_v25 = vpack.c.bf16 %v1101_v23, %v1100_v2 }
 0x3f2   : > { %1727 = vmatprep.mubr.bf16.mxu1 %v1114_v25 }
 0x3f3   : > { %1728 = vmatmul.mubr.bf16.gmra.mrb[20].mxu1 %v1115_v24 }
 0x402   : > { %v1701_v29 = vpop.f32.mrb[40].mxu0 }
 0x403   : > { %v1049_v33 = vpop.f32.mrb[41].mxu0  ;;  %v1106_v37 = vmul.f32 %v1941_v31, %v1701_v29 }
 0x404   : > { %v1702_v35 = vpop.f32.mrb[42].mxu0  ;;  %v1104_v40 = vmul.f32 %v1939_v28, %v1049_v33 }
 0x405   : > { %v1107_v38 = vmul.f32 %v1943_v34, %v1702_v35  ;;  %v1052_v39 = vpop.f32.mrb[43].mxu0 }
 0x406   : > { %v1105_v42 = vmul.f32 %v1945_v36, %v1052_v39 }
 0x407   : > { %v1117_v43 = vpack.c.bf16 %v1107_v38, %v1106_v37 }
 0x408   : > { %v1116_v44 = vpack.c.bf16 %v1105_v42, %v1104_v40 }
 0x40a   : > { %v1705_v46 = vpop.f32.mrb[44].mxu0  ;;  %1731 = vmatprep.mubr.bf16.mxu1 %v1116_v44 }
 0x40b   : > { %v1065_v48 = vpop.f32.mrb[45].mxu0  ;;  %1732 = vmatmul.mubr.bf16.gmra.mrb[24].mxu1 %v1117_v43  ;;  %v1110_v32 = vmul.f32 %v1949_v47, %v1705_v46 }
 0x40c   : > { %v1706_v50 = vpop.f32.mrb[46].mxu0  ;;  %v1108_v53 = vmul.f32 %v1947_v45, %v1065_v48 }
 0x40d   : > { %v1111_v52 = vmul.f32 %v1951_v49, %v1706_v50  ;;  %v1068_v41 = vpop.f32.mrb[47].mxu0 }
 0x40e   : > { %v1109_v51 = vmul.f32 %v1953_v30, %v1068_v41 }
 0x40f   : > { %v1119_v54 = vpack.c.bf16 %v1111_v52, %v1110_v32 }
 0x410   : > { %v1118_v55 = vpack.c.bf16 %v1109_v51, %v1108_v53 }
 0x412   : > { %1735 = vmatprep.mubr.bf16.mxu1 %v1118_v55 }
 0x413   : > { %1736 = vmatmul.mubr.bf16.gmra.mrb[28].mxu1 %v1119_v54 }
 0x4bd   : > { %v1725_v56 = vpop.f32.mrb[16].mxu1 }
 0x4be   : > { %v1225_v58 = vpop.f32.mrb[17].mxu1  ;;  %v1234_v60 = vadd.f32 %v1725_v56, %v1531_v57 }
 0x4bf   : > { %v1726_v59 = vpop.f32.mrb[18].mxu1  ;;  %v1226_v63 = vadd.f32 %v1531_v57, %v1225_v58 }
 0x4c0   : > { %v1237_v61 = vadd.f32 %v1726_v59, %v1531_v57  ;;  %v1228_v62 = vpop.f32.mrb[19].mxu1 }
 0x4c1   : > { %v1229_v3 = vadd.f32 %v1531_v57, %v1228_v62 }
 0x4c2   : > { %v1556_v5 = vpack.c.bf16 %v1237_v61, %v1234_v60 }
 0x4c3   : > { %v1551_v6 = vpack.c.bf16 %v1229_v3, %v1226_v63 }
 0x4c4   : > { %1588 = vst [vmem:[%s2467_s6 + $0x8] sm:$0xff] %v1556_v5  }
 0x4c5   : > { %1552 = vst [vmem:[%s2467_s6] sm:$0xff] %v1551_v6  }
 0x4c6   : > { %v1729_v8 = vpop.f32.mrb[20].mxu1 }
 0x4c7   : > { %v1241_v11 = vpop.f32.mrb[21].mxu1  ;;  %v1250_v14 = vadd.f32 %v1729_v8, %v1531_v57 }
 0x4c8   : > { %v1730_v13 = vpop.f32.mrb[22].mxu1  ;;  %v1242_v16 = vadd.f32 %v1531_v57, %v1241_v11 }
 0x4c9   : > { %v1253_v15 = vadd.f32 %v1730_v13, %v1531_v57  ;;  %v1244_v1 = vpop.f32.mrb[23].mxu1 }
 0x4ca   : > { %v1245_v4 = vadd.f32 %v1531_v57, %v1244_v1 }
 0x4cb   : > { %v1566_v17 = vpack.c.bf16 %v1253_v15, %v1250_v14 }
 0x4cc   : > { %v1561_v18 = vpack.c.bf16 %v1245_v4, %v1242_v16 }
 0x4cd   : > { %1590 = vst [vmem:[%s2467_s6 + $0x18] sm:$0xff] %v1566_v17  }
 0x4ce   : > { %1589 = vst [vmem:[%s2467_s6 + $0x10] sm:$0xff] %v1561_v18  }
 0x4de   : > { %v1733_v19 = vpop.f32.mrb[24].mxu1 }
 0x4df   : > { %v1257_v20 = vpop.f32.mrb[25].mxu1  ;;  %v1266_v22 = vadd.f32 %v1733_v19, %v1531_v57 }
 0x4e0   : > { %v1734_v21 = vpop.f32.mrb[26].mxu1  ;;  %v1258_v23 = vadd.f32 %v1531_v57, %v1257_v20 }
 0x4e1   : > { %v1269_v0 = vadd.f32 %v1734_v21, %v1531_v57  ;;  %v1260_v2 = vpop.f32.mrb[27].mxu1 }
 0x4e2   : > { %v1261_v24 = vadd.f32 %v1531_v57, %v1260_v2 }
 0x4e3   : > { %v1576_v25 = vpack.c.bf16 %v1269_v0, %v1266_v22 }
 0x4e4   : > { %v1571_v9 = vpack.c.bf16 %v1261_v24, %v1258_v23 }
 0x4e5   : > { %1592 = vst [vmem:[%s2467_s6 + $0x28] sm:$0xff] %v1576_v25  }
 0x4e6   : > { %1591 = vst [vmem:[%s2467_s6 + $0x20] sm:$0xff] %v1571_v9   ;;  %v1737_v12 = vpop.f32.mrb[28].mxu1 }
 0x4e7   : > { %v1273_v26 = vpop.f32.mrb[29].mxu1  ;;  %v1282_v7 = vadd.f32 %v1737_v12, %v1531_v57 }
 0x4e8   : > { %v1738_v27 = vpop.f32.mrb[30].mxu1  ;;  %v1274_v29 = vadd.f32 %v1531_v57, %v1273_v26 }
 0x4e9   : > { %v1285_v10 = vadd.f32 %v1738_v27, %v1531_v57  ;;  %v1276_v28 = vpop.f32.mrb[31].mxu1 }
 0x4ea   : > { %v1277_v31 = vadd.f32 %v1531_v57, %v1276_v28 }
 0x4eb   : > { %v1586_v33 = vpack.c.bf16 %v1285_v10, %v1282_v7 }
 0x4ec   : > { %v1581_v34 = vpack.c.bf16 %v1277_v31, %v1274_v29 }
 0x4ed   : > { %1594 = vst [vmem:[%s2467_s6 + $0x38] sm:$0xff] %v1586_v33  }
 0x4ee   : > { %1593 = vst [vmem:[%s2467_s6 + $0x30] sm:$0xff] %v1581_v34  }
 0x4ef   : > { %s1547_s17 = sshll.u32 %s2072_s22, 4  ;;  %s1355_s14 = sshll.u32 %s2467_s6, 4  ;;  %s1356_s14 = int_to_ptr.vmem [resolvable:$true] %s1355_s14 }
 0x4f0   : > { %s1334_s11 = sadd.s32 %s2068_s21, %s1547_s17  ;;  %s2559_s27 = sld [smem:[#allocation22_spill]] }
 0x4f1   : > { %s1543_s26 = sshll.u32 %s1334_s11, 6  ;;  %s2100_s13 = smov 512  }
 0x4f2   : > { %p2560_p8 = scmp.ne.s32.totalorder %s2549_s10, 0  ;;  %s2101_s29 = smov 2048  }
 0x4f3   : > { %s2102_s28 = smov 8   ;;  %s2103_s22 = smov 64  }
 0x4f4   : > { %1756 = sst [smem:[#allocation12]] (%p2560_p8), %s2100_s13  ;;  %s2104_s21 = smov 128  }
 0x4f5   : > { %1757 = sst [smem:[#allocation12 + $0x1]] (%p2560_p8), %s2101_s29  ;;  %s2105_s18 = smov 4  }
 0x4f6   : > { %s1338_s5 = scalar_lea.hbm %s2559_s27, %s1543_s26  ;;  %1758 = sst [smem:[#allocation12 + $0x2]] (%p2560_p8), %s2102_s28 }
 0x4f7   : > { %1759 = sst [smem:[#allocation12 + $0x3]] (%p2560_p8), %s2103_s22  ;;  %s2106_s7 = smov [#allocation11]  }
 0x4f8   : > { %1760 = sst [smem:[#allocation12 + $0x4]] (%p2560_p8), %s2104_s21  ;;  %s2107_s8 = smov 0  }
 0x4f9   : > { %1761 = sst [smem:[#allocation12 + $0x5]] (%p2560_p8), %s2105_s18 }
 0x4fa   : > { %1762 = dma.general (%p2560_p8), %s1356_s14, 1024, %s1338_s5, %s1321_s16, %s2106_s7, [#allocation12], %s2107_s8, 0  }
 0x4fb PF: > { %s2561_s9 = sld [smem:[#allocation17_spill]]  ;;  %s2562_s15 = sld [smem:[#allocation20_spill]] }
 0x4fc   : > { %p1779_p9 = scmp.ge.s32.totalorder %s2084_s25, 2 }
 0x501   : > { %s1383_s6 = sand.u32 1, %s2561_s9   ;;  %p2563_p2 = scmp.ne.s32.totalorder %s2562_s15, 0 }
 0x502   : > { %s1384_s17 = scalar_lea.sflag [#allocation4], %s1383_s6 }
 0x503   : > { %p1772_p5 = pnand %p1779_p9, %p2563_p2 }
 0x505   : > { %2051 = dma.done.wait (!%p1772_p5), %s1384_s17, 1024  }
 0x506   : > { %2053 = vsyncadd (!%p1772_p5), %s1384_s17, 4294966272  ;;  %s22_s25 = sadd.s32 1, %s2084_s25   ;;  %s2564_s11 = sld [smem:[#allocation21_spill]] }
 0x507   : > { %p19_p10 = scmp.ge.s32.totalorder %s22_s25, 6   ;;  %s2565_s10 = sld [smem:[#allocation18_spill]] }
 0x508   : > { %s2566_s16 = sld [smem:[#allocation19_spill]]  ;;  %s2567_s18 = smov %s2060_s19 }
 0x509   : > { %s2568_s19 = smov %s2064_s20  ;;  %s2570_s21 = smov %s2076_s23 }
 0x50a   : > { %s2571_s22 = smov %s2080_s24  ;;  %21 = sbr.rel (!%p19_p10) target bundleno = 10 (0xa), region = 103 }
 0x50c   : > { %s2569_s20 = smov %s2564_s11 }
 0x50d   : > { %s2572_s23 = smov %s2565_s10 }
 0x50e   : > { %s2573_s24 = smov %s2566_s16 }
 0x511   :  { %1389 = vsyncpa [#allocation3], 1 }
 0x512   :  { %1391 = vsyncpa [#allocation3 + $0x1], 1 }
 0x513   :  { %1392 = vsyncpa [#allocation6], 1 }
 0x514   :  { %1393 = vsyncpa [#allocation4], 1 }
 0x515   :  { %1395 = vsyncpa [#allocation4 + $0x1], 1 }

// kernel: tpu_custom_call.1
= control target key start
LH: loop header
LB: loop body
LE: loop exit
PB: predicated region body
PF: predicated region fallthrough
CT: control target
= control target key end

     0   :  { %s2526_s0 = inlined_call_operand.hbm [shape: bf16[2,16,16,128], index: 0, kind: input, shape index: {}]   ;;  %s2527_s1 = inlined_call_operand.hbm [shape: bf16[128,256], index: 1, kind: input, shape index: {}]   ;;  %s2528_s2 = inlined_call_operand.vmem [shape: f32[1,256], index: 2, kind: input, shape index: {}]   ;;  %s2529_s3 = inlined_call_operand.hbm [shape: bf16[128,128], index: 3, kind: input, shape index: {}]   ;;  %s2530_s4 = inlined_call_operand.vmem [shape: f32[1,128], index: 4, kind: input, shape index: {}]   ;;  %s2531_s5 = inlined_call_operand.hbm [shape: bf16[2,16,16,128], index: 5, kind: output, shape index: {}]  }
   0x1   :  { %2542 = sst [smem:[#allocation22_spill]] %s2531_s5 }
   0x2   :  { %10 = vsyncpa [#allocation3], 0 }
   0x3   :  { %12 = vsyncpa [#allocation3 + $0x1], 0 }
   0x4   :  { %13 = vsyncpa [#allocation6], 0 }
   0x5   :  { %14 = vsyncpa [#allocation4], 0 }
   0x6   :  { %16 = vsyncpa [#allocation4 + $0x1], 0  ;;  %s2138_s18 = smov 0   ;;  %s2140_s19 = smov 0  }
   0x7   :  { %s2142_s20 = smov 0   ;;  %s2144_s21 = smov 0  }
   0x8   :  { %s2146_s22 = smov 0   ;;  %s2148_s23 = smov 0  }
   0x9   :  { %s2150_s24 = smov 0   ;;  %s2152_s25 = smov 0  }
   0xa LB: > { %2543 = sst [smem:[#allocation17_spill]] %s2056_s18  ;;  %s1482_s26 = sadd.s32 4294967295, %s2084_s25   ;;  %s2084_s25 = sphi %s2152_s25, %s22_s25   ;;  %s2080_s24 = sphi %s2150_s24, %s2573_s24   ;;  %s2076_s23 = sphi %s2148_s23, %s2572_s23   ;;  %s2072_s22 = sphi %s2146_s22, %s2571_s22   ;;  %s2068_s21 = sphi %s2144_s21, %s2570_s21   ;;  %s2064_s20 = sphi %s2142_s20, %s2569_s20   ;;  %s2060_s19 = sphi %s2140_s19, %s2568_s19   ;;  %s2056_s18 = sphi %s2138_s18, %s2567_s18  }
   0xb   : > { %s1483_s27 = sadd.s32 4294967294, %s2084_s25   ;;  %s34_s28 = sadd.s32 1, %s2076_s23 }
   0xc   : > { %s37_s29 = sadd.s32 1, %s2080_s24  ;;  %p35_p0 = scmp.ge.s32.totalorder %s34_s28, 2 }
   0xd   : > { %s52_s30 = sadd.s32 1, %s2064_s20  ;;  %p59_p1 = scmp.ne.s32.totalorder %s2064_s20, %s2060_s19 }
   0xe   : > { %p60_p2 = scmp.eq.s32.totalorder %s2084_s25, 0  ;;  %s2575_s28 = smov (%p35_p0, %s34_s28), 0 }
   0xf   : > { %2544 = sst [smem:[#allocation18_spill]] %s2575_s28  ;;  %s2577_s29 = smov (!%p35_p0, %s37_s29), %s2080_s24 }
  0x10   : > { %s48_s6 = ssub.s32 %s2076_s23, %s2575_s28  ;;  %p2191_p3 = por %p60_p2, %p59_p1 }
  0x11   : > { %p39_p4 = scmp.ge.s32.totalorder %s2577_s29, 2  ;;  %p65_p5 = scmp.ne.s32.totalorder %s2060_s19, %s2056_s18 }
  0x12   : > { %s2545_s7 = scalar_select %p2191_p3, 1, 0 }
  0x13   : > { %p2197_p6 = scmp.eq.s32.totalorder %s1482_s26, 0  ;;  %p177_p7 = scmp.eq.s32.totalorder %s1482_s26, 3 }
  0x14   : > { %s2579_s29 = smov (%p39_p4, %s2577_s29), 0  ;;  %p183_p10 = scmp.eq.s32.totalorder %s1483_s27, 3 }
  0x15   : > { %s2546_s8 = scalar_select %p2197_p6, 1, 0 }
  0x16   : > { %2547 = sst [smem:[#allocation19_spill]] %s2579_s29  ;;  %p2205_p8 = por %p2197_p6, %p65_p5 }
  0x17   : > { %p2209_p9 = por %p177_p7, %p59_p1  ;;  %s46_s11 = ssub.s32 %s2080_s24, %s2579_s29 }
  0x18   : > { %s2548_s9 = scalar_select %p2205_p8, 1, 0 }
  0x19   : > { %s2549_s10 = scalar_select %p2209_p9, 1, 0 }
  0x1a   : > { %s49_s12 = sor.u32 %s48_s6, %s46_s11  ;;  %p1484_p11 = scmp.ge.s32.totalorder %s2084_s25, 1 }
  0x1b   : > { %p50_p12 = scmp.eq.s32.totalorder %s49_s12, 0  ;;  %p2216_p13 = por %p183_p10, %p65_p5 }
  0x1c   : > { %p190_p0 = scmp.lt.s32.totalorder %s2084_s25, 5  ;;  %s2086_s16 = smov [#allocation5]  }
  0x1d   : > { %s2550_s13 = scalar_select %p2216_p13, 1, 0 }
  0x1e   : > { %s2222_s14 = scalar_select %p50_p12, %s2064_s20, %s52_s30  }
  0x1f   : > { %2551 = sst [smem:[#allocation20_spill]] %s2550_s13  ;;  %p2224_p2 = pnand %p1484_p11, %p190_p0 }
  0x20   : > { %2552 = sst [smem:[#allocation21_spill]] %s2222_s14  ;;  %s202_s17 = sshll.u32 %s2086_s16, 4  ;;  %s203_s17 = int_to_ptr.vmem [resolvable:$true] %s202_s17 }
  0x21   : > { %s2553_s15 = scalar_select %p2224_p2, 1, 0 }
  0x22   : > { %p1764_p1 = pneg %p2224_p2  ;;  %s2087_s27 = smov [#allocation7]  }
  0x23   : > { %s218_s30 = sshll.u32 %s2087_s27, 4  ;;  %s1954_s12 = scalar_lea.hbm %s2527_s1, 2048  ;;  %s2236_s30 = int_to_ptr.vmem [resolvable:$true] %s218_s30 }
  0x24   : > { %p2232_p4 = pnand %p1764_p1, %p2197_p6  ;;  %p1955_p5 = scmp.ne.s32.totalorder %s2527_s1, %s1954_s12 }
  0x25   : > { %p1961_p12 = scmp.lt.u32.totalorder %s1954_s12, %s2527_s1 }
  0x26   : > { %p1956_p7 = pneg %p2232_p4 }
  0x28   : > { %p1957_p10 = pnand %p1956_p7, %p1955_p5 }
  0x2a   : > { %p1958_p11 = pneg %p1957_p10 }
  0x2c   : > { %p1963_p0 = pnand %p1961_p12, %p1958_p11 }
  0x2e   : > { %1966 = shalt.err (!%p1963_p0)
}
  0x2f   : > { %s1967_s27 = scalar_lea.vmem %s203_s17, 2048  ;;  %p1975_p6 = scmp.lt.s32.totalorder %s203_s17, %s203_s17 }
  0x30   : > { %p1968_p1 = scmp.ne.s32.totalorder %s203_s17, %s1967_s27  ;;  %p1976_p8 = scmp.lt.s32.totalorder %s1967_s27, %s1967_s27 }
  0x32   : > { %p1970_p13 = pnand %p1968_p1, %p1956_p7  ;;  %p1977_p2 = por %p1976_p8, %p1975_p6 }
  0x34   : > { %p1971_p9 = pneg %p1970_p13 }
  0x36   : > { %p1978_p3 = pnand %p1977_p2, %p1971_p9 }
  0x38   : > { %1981 = shalt.err (!%p1978_p3)
}
  0x39   : > { %s2088_s29 = smov 128   ;;  %s2089_s6 = smov 8  }
  0x3a   : > { %1767 = dma.hbm_to_vmem [thread:$0]  (!%p2232_p4), %s2527_s1, 2048, %s203_s17, [#allocation6], %s2088_s29, %s2088_s29, %s2089_s6  }
  0x3b   : > { %s1982_s16 = scalar_lea.hbm %s2529_s3, 1024 }
  0x3c   : > { %p1983_p13 = scmp.ne.s32.totalorder %s2529_s3, %s1982_s16  ;;  %p1989_p8 = scmp.lt.u32.totalorder %s1982_s16, %s2529_s3 }
  0x3e   : > { %p1985_p3 = pnand %p1983_p13, %p1956_p7 }
  0x40   : > { %p1986_p6 = pneg %p1985_p3 }
  0x42   : > { %p1991_p9 = pnand %p1989_p8, %p1986_p6 }
  0x44   : > { %1994 = shalt.err (!%p1991_p9)
}
  0x45   : > { %s1995_s17 = scalar_lea.vmem %s2236_s30, 1024  ;;  %p2003_p11 = scmp.lt.s32.totalorder %s2236_s30, %s2236_s30 }
  0x46   : > { %p1996_p2 = scmp.ne.s32.totalorder %s2236_s30, %s1995_s17  ;;  %p2004_p12 = scmp.lt.s32.totalorder %s1995_s17, %s1995_s17 }
  0x48   : > { %p1998_p5 = pnand %p1996_p2, %p1956_p7  ;;  %p2005_p0 = por %p2004_p12, %p2003_p11 }
  0x4a   : > { %p1999_p10 = pneg %p1998_p5 }
  0x4c   : > { %p2006_p1 = pnand %p2005_p0, %p1999_p10 }
  0x4e   : > { %2009 = shalt.err (!%p2006_p1)
}
  0x4f   : > { %s2090_s5 = smov 64   ;;  %s2091_s18 = smov 4  }
  0x50   : > { %1770 = dma.hbm_to_vmem [thread:$0]  (!%p2232_p4), %s2529_s3, 1024, %s2236_s30, [#allocation6], %s2090_s5, %s2090_s5, %s2091_s18  }
  0x51   : > { %p1487_p13 = scmp.ge.s32.totalorder %s2084_s25, 4 }
  0x53   : > { %231 = sbr.rel (%p1487_p13) target bundleno = 107 (0x6b), region = 32 }
  0x5a   : > { %s235_s6 = sand.u32 1, %s2064_s20   ;;  %s1546_s28 = sshll.u32 %s2080_s24, 4 }
  0x5b   : > { %s1488_s14 = sshll.u32 %s235_s6, 6  ;;  %s246_s11 = sadd.s32 %s2076_s23, %s1546_s28 }
  0x5c   : > { %s1491_s26 = sshll.u32 %s246_s11, 6  ;;  %s239_s12 = scalar_lea.vmem [#allocation2], %s1488_s14 }
  0x5d   : > { %s263_s16 = sshll.u32 %s239_s12, 4  ;;  %s250_s17 = scalar_lea.hbm %s2526_s0, %s1491_s26  ;;  %s264_s16 = int_to_ptr.vmem [resolvable:$true] %s263_s16 }
  0x5e   : > { %p2555_p4 = scmp.ne.s32.totalorder %s2545_s7, 0  ;;  %s2092_s13 = smov 2048  }
  0x5f   : > { %s2093_s29 = smov 512   ;;  %s2094_s28 = smov 8  }
  0x60   : > { %s1743_s5 = scalar_select %p2555_p4, [#allocation0], [#allocation13] }
  0x61   : > { %1744 = sst [smem:[#allocation10]] (%p2555_p4), %s2092_s13  ;;  %s2095_s14 = smov 128  }
  0x62   : > { %s255_s18 = sld [smem:[%s1743_s5]]   ;;  %s2096_s11 = smov 64  }
  0x63   : > { %1745 = sst [smem:[#allocation10 + $0x1]] (%p2555_p4), %s2093_s29  ;;  %s2097_s26 = smov 4  }
  0x64   : > { %1746 = sst [smem:[#allocation10 + $0x2]] (%p2555_p4), %s2094_s28  ;;  %s236_s27 = scalar_lea.sflag [#allocation3], %s235_s6 }
  0x65   : > { %1747 = sst [smem:[#allocation10 + $0x3]] (%p2555_p4), %s2095_s14  ;;  %s2098_s5 = smov [#allocation9]  }
  0x66   : > { %1748 = sst [smem:[#allocation10 + $0x4]] (%p2555_p4), %s2096_s11 }
  0x67   : > { %1749 = sst [smem:[#allocation10 + $0x5]] (%p2555_p4), %s2097_s26 }
  0x68   : > { %s1492_s12 = sshll.u32 %s255_s18, 26 }
  0x69   : > { %s1493_s30 = sadd.s32 134217728, %s1492_s12 }
  0x6a   : > { %1750 = dma.general (%p2555_p4), %s250_s17, 1024, %s264_s16, %s236_s27, %s2098_s5, [#allocation10], %s1493_s30, 0  }
  0x6b PF: > { %p2556_p7 = scmp.ne.s32.totalorder %s2553_s15, 0 }
  0x6c   : > { %s2311_s13 = sand.u32 (!%p2556_p7), 1, %s2060_s19   ;;  %p2557_p3 = scmp.ne.s32.totalorder (!%p2556_p7), %s2548_s9, 0 }
  0x6d   : > { %288 = sbr.rel (%p2556_p7) target bundleno = 1275 (0x4fb), region = 40  ;;  %s1495_s29 = sshll.u32 (!%p2556_p7), %s2311_s13, 6 }
  0x6e   : > { %s291_s28 = scalar_lea.sflag (!%p2556_p7), [#allocation3], %s2311_s13  ;;  %s2317_s18 = scalar_lea.vmem (!%p2556_p7), [#allocation2], %s1495_s29 }
  0x74   : > { %2043 = dma.done.wait (%p2557_p3), %s291_s28, 1024  }
  0x75   : > { %2045 = vsyncadd (%p2557_p3), %s291_s28, 4294966272  ;;  %p2558_p6 = scmp.ne.s32.totalorder %s2546_s8, 0 }
  0x77   : > { %2047 = dma.done.wait (%p2558_p6), [#allocation6], 3072  }
  0x78   : > { %2049 = vsyncadd (%p2558_p6), [#allocation6], 4294964224  ;;  %v2099_v0 = vmov 0   ;;  %v1866_v1 = vld [vmem:[#allocation5 + $0x4] ss:$8 sps:$4 sm:$0xff]   ;;  %v1892_v19 = vld [vmem:[%s2317_s18 + $0x10] sm:$0xff]   ;;  %v368_v25 = vlaneseq }
  0x79   : > { %538 = vmatprep.mubr.bf16.mxu0 %v2099_v0  ;;  %v1868_v2 = vld [vmem:[#allocation5] ss:$8 sps:$4 sm:$0xff]   ;;  %506 = vmatprep.subr.bf16.mxu0 %v1866_v1  ;;  %v1869_v3 = vld [vmem:[#allocation5 + $0x14] ss:$8 sps:$4 sm:$0xff]   ;;  %v1871_v4 = vld [vmem:[#allocation5 + $0x10] ss:$8 sps:$4 sm:$0xff]  }
  0x7a   : > { %507 = vmatpush1.bf16.msra.mxu0 %v1868_v2  ;;  %v1872_v5 = vld [vmem:[#allocation5 + $0x24] ss:$8 sps:$4 sm:$0xff]   ;;  %v1874_v6 = vld [vmem:[#allocation5 + $0x20] ss:$8 sps:$4 sm:$0xff]   ;;  %v1875_v7 = vld [vmem:[#allocation5 + $0x34] ss:$8 sps:$4 sm:$0xff]  }
  0x7b   : > { %508 = vmatprep.subr.bf16.mxu0 %v1869_v3  ;;  %v1877_v8 = vld [vmem:[#allocation5 + $0x30] ss:$8 sps:$4 sm:$0xff]   ;;  %v1878_v9 = vld [vmem:[#allocation5 + $0x44] ss:$8 sps:$4 sm:$0xff]   ;;  %v1880_v10 = vld [vmem:[#allocation5 + $0x40] ss:$8 sps:$4 sm:$0xff]  }
  0x7c   : > { %v1881_v11 = vld [vmem:[#allocation5 + $0x54] ss:$8 sps:$4 sm:$0xff]   ;;  %v1883_v12 = vld [vmem:[#allocation5 + $0x50] ss:$8 sps:$4 sm:$0xff]   ;;  %v1884_v13 = vld [vmem:[#allocation5 + $0x64] ss:$8 sps:$4 sm:$0xff]  }
  0x7d   : > { %v1886_v14 = vld [vmem:[#allocation5 + $0x60] ss:$8 sps:$4 sm:$0xff]   ;;  %v1887_v15 = vld [vmem:[#allocation5 + $0x74] ss:$8 sps:$4 sm:$0xff]   ;;  %v1889_v16 = vld [vmem:[#allocation5 + $0x70] ss:$8 sps:$4 sm:$0xff]  }
  0x7e   : > { %509 = vmatpush1.bf16.msra.mxu0 %v1871_v4  ;;  %v1890_v17 = vld [vmem:[%s2317_s18] sm:$0xff]   ;;  %v1891_v18 = vld [vmem:[%s2317_s18 + $0x8] sm:$0xff]   ;;  %v1893_v20 = vld [vmem:[%s2317_s18 + $0x18] sm:$0xff]   ;;  %v369_v26 = vshrl.u32 %v368_v25, 7  ;;  %vm765_vm0 = vcmask 523264   ;;  %s2467_s6 = scalar_lea.vmem [#allocation8], %s1495_s29 }
  0x7f   : > { %510 = vmatprep.subr.bf16.mxu0 %v1872_v5  ;;  %v1894_v21 = vld [vmem:[%s2317_s18 + $0x20] sm:$0xff]   ;;  %v1895_v22 = vld [vmem:[%s2317_s18 + $0x28] sm:$0xff]   ;;  %v1896_v23 = vld [vmem:[%s2317_s18 + $0x30] sm:$0xff]   ;;  %s1321_s16 = scalar_lea.sflag [#allocation4], %s2311_s13 }
  0x80   : > { %v1897_v24 = vld [vmem:[%s2317_s18 + $0x38] sm:$0xff]   ;;  %v370_v27 = vsub.s32 0, %v369_v26  ;;  %v366_v28 = vld [vmem:[%s2528_s2] sm:$0x3]  ;;  %v374_v29 = vsub.s32 1, %v369_v26 }
  0x82   : > { %511 = vmatpush1.bf16.msra.mxu0 %v1874_v6  ;;  %v2338_v30 = vrot.slane %v366_v28, %v370_v27  ;;  %v2340_v32 = vrot.slane %v366_v28, %v374_v29 }
  0x83   : > { %512 = vmatprep.subr.bf16.mxu0 %v1875_v7 }
  0x86   : > { %513 = vmatpush1.bf16.msra.mxu0 %v1877_v8 }
  0x87   : > { %514 = vmatprep.subr.bf16.mxu0 %v1878_v9 }
  0x8a   : > { %515 = vmatpush1.bf16.msra.mxu0 %v1880_v10 }
  0x8b   : > { %516 = vmatprep.subr.bf16.mxu0 %v1881_v11 }
  0x8e   : > { %517 = vmatpush1.bf16.msra.mxu0 %v1883_v12 }
  0x8f   : > { %518 = vmatprep.subr.bf16.mxu0 %v1884_v13 }
  0x92   : > { %519 = vmatpush1.bf16.msra.mxu0 %v1886_v14 }
  0x93   : > { %520 = vmatprep.subr.bf16.mxu0 %v1887_v15 }
  0x96   : > { %521 = vmatpush1.bf16.msra.mxu0 %v1889_v16 }
  0x99   : > { %539 = vmatmul.mubr.bf16.vlgmr.msra.gmra.mrb[0].mxu0 %v1890_v17 }
  0x9a   : > { %548 = vmatprep.mubr.bf16.mxu0 %v2099_v0 }
  0xa1   : > { %549 = vmatmul.mubr.bf16.gmra.mrb[4].mxu0 %v1891_v18 }
  0xa2   : > { %558 = vmatprep.mubr.bf16.mxu0 %v2099_v0 }
  0xa9   : > { %559 = vmatmul.mubr.bf16.gmra.mrb[8].mxu0 %v1892_v19 }
  0xaa   : > { %568 = vmatprep.mubr.bf16.mxu0 %v2099_v0 }
  0xb1   : > { %569 = vmatmul.mubr.bf16.gmra.mrb[12].mxu0 %v1893_v20 }
  0xb2   : > { %578 = vmatprep.mubr.bf16.mxu0 %v2099_v0 }
  0xb9   : > { %579 = vmatmul.mubr.bf16.gmra.mrb[16].mxu0 %v1894_v21 }
  0xba   : > { %588 = vmatprep.mubr.bf16.mxu0 %v2099_v0 }
  0xc1   : > { %589 = vmatmul.mubr.bf16.gmra.mrb[20].mxu0 %v1895_v22 }
  0xc2   : > { %598 = vmatprep.mubr.bf16.mxu0 %v2099_v0 }
  0xc9   : > { %599 = vmatmul.mubr.bf16.gmra.mrb[24].mxu0 %v1896_v23 }
  0xca   : > { %608 = vmatprep.mubr.bf16.mxu0 %v2099_v0 }
  0xd1   : > { %609 = vmatmul.mubr.bf16.gmra.mrb[28].mxu0 %v1897_v24 }
 0x16c   : > { %v540_v31 = vpop.f32.mrb[0].mxu0 }
 0x16d   : > { %v542_v33 = vpop.f32.mrb[1].mxu0  ;;  %v541_v35 = vadd.f32 %v540_v31, %v2338_v30 }
 0x16e   : > { %v544_v34 = vpop.f32.mrb[2].mxu0  ;;  %v543_v38 = vadd.f32 %v542_v33, %v2340_v32 }
 0x16f   : > { %v545_v36 = vadd.f32 %v544_v34, %v2338_v30  ;;  %v546_v37 = vpop.f32.mrb[3].mxu0 }
 0x170   : > { %v547_v39 = vadd.f32 %v546_v37, %v2340_v32 }
 0x171   : > { %v619_v40 = vpack.c.bf16 %v545_v36, %v541_v35 }
 0x172   : > { %v2346_v41 = vpack.c.bf16 %v547_v39, %v543_v38 }
 0x173   : > { %1643 = vmatprep.subr.bf16.mxu0 %v619_v40  ;;  %1651 = vmatprep.mubr.bf16.mxu0 %v619_v40 }
 0x174   : > { %v550_v42 = vpop.f32.mrb[4].mxu0  ;;  %1644 = vmatpush3.bf16.xpose.msra.mxu0 %v619_v40 }
 0x175   : > { %v552_v43 = vpop.f32.mrb[5].mxu0  ;;  %v551_v45 = vadd.f32 %v550_v42, %v2338_v30 }
 0x176   : > { %v554_v44 = vpop.f32.mrb[6].mxu0  ;;  %v553_v48 = vadd.f32 %v552_v43, %v2340_v32 }
 0x177   : > { %v555_v46 = vadd.f32 %v554_v44, %v2338_v30  ;;  %v556_v47 = vpop.f32.mrb[7].mxu0 }
 0x178   : > { %v557_v49 = vadd.f32 %v556_v47, %v2340_v32 }
 0x179   : > { %v621_v50 = vpack.c.bf16 %v555_v46, %v551_v45 }
 0x17a   : > { %v2352_v51 = vpack.c.bf16 %v557_v49, %v553_v48 }
 0x17b   : > { %1645 = vmatprep.subr.bf16.mxu0 %v621_v50 }
 0x17c   : > { %v560_v52 = vpop.f32.mrb[8].mxu0  ;;  %1646 = vmatpush3.bf16.xpose.msra.mxu0 %v621_v50 }
 0x17d   : > { %v562_v53 = vpop.f32.mrb[9].mxu0  ;;  %v561_v55 = vadd.f32 %v560_v52, %v2338_v30 }
 0x17e   : > { %v564_v54 = vpop.f32.mrb[10].mxu0  ;;  %v563_v58 = vadd.f32 %v562_v53, %v2340_v32 }
 0x17f   : > { %v565_v56 = vadd.f32 %v564_v54, %v2338_v30  ;;  %v566_v57 = vpop.f32.mrb[11].mxu0 }
 0x180   : > { %v567_v59 = vadd.f32 %v566_v57, %v2340_v32 }
 0x181   : > { %v623_v60 = vpack.c.bf16 %v565_v56, %v561_v55 }
 0x182   : > { %v2358_v61 = vpack.c.bf16 %v567_v59, %v563_v58 }
 0x183   : > { %1647 = vmatprep.subr.bf16.mxu0 %v623_v60 }
 0x184   : > { %v570_v62 = vpop.f32.mrb[12].mxu0  ;;  %1648 = vmatpush3.bf16.xpose.msra.mxu0 %v623_v60 }
 0x185   : > { %v572_v63 = vpop.f32.mrb[13].mxu0  ;;  %v571_v1 = vadd.f32 %v570_v62, %v2338_v30 }
 0x186   : > { %v574_v0 = vpop.f32.mrb[14].mxu0  ;;  %v573_v4 = vadd.f32 %v572_v63, %v2340_v32 }
 0x187   : > { %v575_v2 = vadd.f32 %v574_v0, %v2338_v30  ;;  %v576_v3 = vpop.f32.mrb[15].mxu0 }
 0x188   : > { %v577_v5 = vadd.f32 %v576_v3, %v2340_v32 }
 0x189   : > { %v625_v6 = vpack.c.bf16 %v575_v2, %v571_v1 }
 0x18a   : > { %v2364_v7 = vpack.c.bf16 %v577_v5, %v573_v4 }
 0x18b   : > { %1649 = vmatprep.subr.bf16.mxu0 %v625_v6 }
 0x18c   : > { %v580_v8 = vpop.f32.mrb[16].mxu0  ;;  %1650 = vmatpush3.bf16.xpose.msra.mxu0 %v625_v6 }
 0x18d   : > { %v582_v9 = vpop.f32.mrb[17].mxu0  ;;  %v581_v11 = vadd.f32 %v580_v8, %v2338_v30 }
 0x18e   : > { %v584_v10 = vpop.f32.mrb[18].mxu0  ;;  %v583_v14 = vadd.f32 %v582_v9, %v2340_v32 }
 0x18f   : > { %v585_v12 = vadd.f32 %v584_v10, %v2338_v30  ;;  %v586_v13 = vpop.f32.mrb[19].mxu0 }
 0x190   : > { %v587_v15 = vadd.f32 %v586_v13, %v2340_v32 }
 0x191   : > { %v627_v16 = vpack.c.bf16 %v585_v12, %v581_v11 }
 0x192   : > { %v628_v17 = vpack.c.bf16 %v587_v15, %v583_v14 }
 0x193   : > { %1652 = vmatmul.mubr.bf16.vlgmr.msra.gmra.mrb[32].mxu0 %v621_v50  ;;  %1659 = vmatprep.subr.bf16.mxu1 %v627_v16 }
 0x194   : > { %v590_v18 = vpop.f32.mrb[20].mxu0  ;;  %1655 = vmatprep.mubr.bf16.mxu0 %v623_v60  ;;  %1660 = vmatpush3.bf16.xpose.msra.mxu1 %v627_v16 }
 0x195   : > { %v592_v19 = vpop.f32.mrb[21].mxu0  ;;  %1691 = vmatprep.subr.bf16.mxu0 %v628_v17  ;;  %1667 = vmatprep.mubr.bf16.mxu1 %v627_v16  ;;  %v591_v21 = vadd.f32 %v590_v18, %v2338_v30 }
 0x196   : > { %v594_v20 = vpop.f32.mrb[22].mxu0  ;;  %1692 = vmatpush3.bf16.msra.mxu0 %v628_v17  ;;  %v593_v24 = vadd.f32 %v592_v19, %v2340_v32 }
 0x197   : > { %v595_v22 = vadd.f32 %v594_v20, %v2338_v30  ;;  %v596_v23 = vpop.f32.mrb[23].mxu0 }
 0x198   : > { %v597_v25 = vadd.f32 %v596_v23, %v2340_v32 }
 0x199   : > { %v629_v26 = vpack.c.bf16 %v595_v22, %v591_v21 }
 0x19a   : > { %v630_v27 = vpack.c.bf16 %v597_v25, %v593_v24 }
 0x19b   : > { %1656 = vmatmul.mubr.bf16.gmra.mrb[36].mxu0 %v625_v6  ;;  %1661 = vmatprep.subr.bf16.mxu1 %v629_v26 }
 0x19c   : > { %v600_v28 = vpop.f32.mrb[24].mxu0  ;;  %1662 = vmatpush3.bf16.xpose.msra.mxu1 %v629_v26  ;;  %1693 = vmatprep.subr.bf16.mxu0 %v630_v27 }
 0x19d   : > { %v602_v29 = vpop.f32.mrb[25].mxu0  ;;  %1694 = vmatpush3.bf16.msra.mxu0 %v630_v27  ;;  %v601_v33 = vadd.f32 %v600_v28, %v2338_v30 }
 0x19e   : > { %v604_v31 = vpop.f32.mrb[26].mxu0  ;;  %v603_v36 = vadd.f32 %v602_v29, %v2340_v32 }
 0x19f   : > { %v605_v34 = vadd.f32 %v604_v31, %v2338_v30  ;;  %v606_v35 = vpop.f32.mrb[27].mxu0 }
 0x1a0   : > { %v607_v37 = vadd.f32 %v606_v35, %v2340_v32 }
 0x1a1   : > { %v631_v38 = vpack.c.bf16 %v605_v34, %v601_v33 }
 0x1a2   : > { %v632_v39 = vpack.c.bf16 %v607_v37, %v603_v36 }
 0x1a3   : > { %1663 = vmatprep.subr.bf16.mxu1 %v631_v38 }
 0x1a4   : > { %v610_v40 = vpop.f32.mrb[28].mxu0  ;;  %1664 = vmatpush3.bf16.xpose.msra.mxu1 %v631_v38  ;;  %1695 = vmatprep.subr.bf16.mxu0 %v632_v39 }
 0x1a5   : > { %v612_v42 = vpop.f32.mrb[29].mxu0  ;;  %1696 = vmatpush3.bf16.msra.mxu0 %v632_v39  ;;  %v611_v44 = vadd.f32 %v610_v40, %v2338_v30 }
 0x1a6   : > { %v614_v43 = vpop.f32.mrb[30].mxu0  ;;  %v613_v47 = vadd.f32 %v612_v42, %v2340_v32 }
 0x1a7   : > { %v615_v45 = vadd.f32 %v614_v43, %v2338_v30  ;;  %v616_v46 = vpop.f32.mrb[31].mxu0 }
 0x1a8   : > { %v617_v48 = vadd.f32 %v616_v46, %v2340_v32 }
 0x1a9   : > { %v633_v49 = vpack.c.bf16 %v615_v45, %v611_v44 }
 0x1aa   : > { %v634_v50 = vpack.c.bf16 %v617_v48, %v613_v47 }
 0x1ab   : > { %1665 = vmatprep.subr.bf16.mxu1 %v633_v49 }
 0x1ac   : > { %1666 = vmatpush3.bf16.xpose.msra.mxu1 %v633_v49  ;;  %1697 = vmatprep.subr.bf16.mxu0 %v634_v50 }
 0x1ad   : > { %1675 = vmatprep.subr.bf16.mxu1 %v2346_v41  ;;  %1698 = vmatpush3.bf16.msra.mxu0 %v634_v50 }
 0x1b3   : > { %1668 = vmatmul.mubr.bf16.vlgmr.msra.gmra.mrb[0].mxu1 %v629_v26 }
 0x1b4   : > { %1671 = vmatprep.mubr.bf16.mxu1 %v631_v38  ;;  %1676 = vmatpush3.bf16.msra.mxu1 %v2346_v41 }
 0x1b5   : > { %1677 = vmatprep.subr.bf16.mxu1 %v2352_v51 }
 0x1b8   : > { %1678 = vmatpush3.bf16.msra.mxu1 %v2352_v51 }
 0x1b9   : > { %1679 = vmatprep.subr.bf16.mxu1 %v2358_v61 }
 0x1bb   : > { %1672 = vmatmul.mubr.bf16.gmra.mrb[4].mxu1 %v633_v49 }
 0x1bc   : > { %1680 = vmatpush3.bf16.msra.mxu1 %v2358_v61 }
 0x1bd   : > { %1681 = vmatprep.subr.bf16.mxu1 %v2364_v7 }
 0x1c0   : > { %1682 = vmatpush3.bf16.msra.mxu1 %v2364_v7 }
 0x266   : > { %v1653_v30 = vpop.f32.mrb[32].mxu0 }
 0x267   : > { %v669_v32 = vpop.f32.mrb[33].mxu0  ;;  %v772_v52 = vsel %vm765_vm0, %v1653_v30, -inf }
 0x268   : > { %773 = vmax.xlane.f32.xlu1 %v772_v52  ;;  %v1654_v41 = vpop.f32.mrb[34].mxu0  ;;  %v766_v53 = vsel %vm765_vm0, %v669_v32, -inf }
 0x269   : > { %767 = vmax.xlane.f32.xlu0 %v766_v53  ;;  %v672_v51 = vpop.f32.mrb[35].mxu0  ;;  %v775_v54 = vsel %vm765_vm0, %v1654_v41, -inf }
 0x26a   : > { %v769_v55 = vsel %vm765_vm0, %v672_v51, -inf }
 0x26c   : > { %776 = vmax.xlane.f32.xlu1 %v775_v54 }
 0x26d   : > { %770 = vmax.xlane.f32.xlu0 %v769_v55 }
 0x26e   : > { %v1657_v56 = vpop.f32.mrb[36].mxu0 }
 0x26f   : > { %v685_v57 = vpop.f32.mrb[37].mxu0  ;;  %v784_v62 = vsel %vm765_vm0, %v1657_v56, -inf }
 0x270   : > { %v1658_v58 = vpop.f32.mrb[38].mxu0  ;;  %v778_v59 = vsel %vm765_vm0, %v685_v57, -inf }
 0x271   : > { %779 = vmax.xlane.f32.xlu0 %v778_v59  ;;  %v688_v60 = vpop.f32.mrb[39].mxu0  ;;  %v787_v63 = vsel %vm765_vm0, %v1658_v58, -inf }
 0x272   : > { %v781_v61 = vsel %vm765_vm0, %v688_v60, -inf }
 0x273   : > { %782 = vmax.xlane.f32.xlu1 %v781_v61 }
 0x275   : > { %785 = vmax.xlane.f32.xlu0 %v784_v62 }
 0x277   : > { %788 = vmax.xlane.f32.xlu1 %v787_v63 }
 0x286   : > { %v2398_v0 = vpop.f32.mrb[0].mxu1 }
 0x287   : > { %v2400_v1 = vpop.f32.mrb[1].mxu1  ;;  %v796_v6 = vsel %vm765_vm0, %v2398_v0, -inf }
 0x288   : > { %v2402_v2 = vpop.f32.mrb[2].mxu1  ;;  %v790_v3 = vsel %vm765_vm0, %v2400_v1, -inf }
 0x289   : > { %v2406_v4 = vpop.f32.mrb[3].mxu1  ;;  %791 = vmax.xlane.f32.xlu0 %v790_v3  ;;  %v799_v8 = vsel %vm765_vm0, %v2402_v2, -inf }
 0x28a   : > { %v793_v5 = vsel %vm765_vm0, %v2406_v4, -inf }
 0x28b   : > { %794 = vmax.xlane.f32.xlu1 %v793_v5 }
 0x28d   : > { %797 = vmax.xlane.f32.xlu0 %v796_v6 }
 0x28e   : > { %v2412_v7 = vpop.f32.mrb[4].mxu1 }
 0x28f   : > { %v2416_v9 = vpop.f32.mrb[5].mxu1  ;;  %800 = vmax.xlane.f32.xlu1 %v799_v8  ;;  %v808_v14 = vsel %vm765_vm0, %v2412_v7, -inf }
 0x290   : > { %v2418_v10 = vpop.f32.mrb[6].mxu1  ;;  %v802_v11 = vsel %vm765_vm0, %v2416_v9, -inf }
 0x291   : > { %v2422_v12 = vpop.f32.mrb[7].mxu1  ;;  %803 = vmax.xlane.f32.xlu0 %v802_v11  ;;  %v811_v15 = vsel %vm765_vm0, %v2418_v10, -inf }
 0x292   : > { %v805_v13 = vsel %vm765_vm0, %v2422_v12, -inf }
 0x293   : > { %806 = vmax.xlane.f32.xlu1 %v805_v13 }
 0x295   : > { %809 = vmax.xlane.f32.xlu0 %v808_v14 }
 0x297   : > { %812 = vmax.xlane.f32.xlu1 %v811_v15 }
 0x2f5   : > { %v774_v16 = vpop.xlane.xlu1 %773 }
 0x2f6   : > { %v768_v17 = vpop.xlane.xlu0 %767  ;;  %v816_v19 = vsub.f32 %v1653_v30, %v774_v16 }
 0x2f7   : > { %v814_v22 = vsub.f32 %v669_v32, %v768_v17 }
 0x2f9   : > { %v777_v18 = vpop.xlane.xlu1 %776 }
 0x2fa   : > { %v817_v20 = vsub.f32 %v1654_v41, %v777_v18  ;;  %v771_v21 = vpop.xlane.xlu0 %770 }
 0x2fb   : > { %v815_v23 = vsub.f32 %v672_v51, %v771_v21 }
 0x2fc   : > { %v831_v24 = vpack.c.bf16 %v817_v20, %v816_v19 }
 0x2fd   : > { %v830_v25 = vpack.c.bf16 %v815_v23, %v814_v22 }
 0x2fe   : > { %v842_v26 = vmul.bf16 1069105081, %v831_v24  ;;  %v780_v27 = vpop.xlane.xlu0 %779 }
 0x2ff   : > { %v839_v28 = vmul.bf16 1069105081, %v830_v25  ;;  %v818_v31 = vsub.f32 %v685_v57, %v780_v27 }
 0x300   : > { %1906 = vpow.bf16 %v842_v26  ;;  %v783_v29 = vpop.xlane.xlu1 %782 }
 0x301   : > { %1908 = vpow.bf16 %v839_v28  ;;  %v819_v33 = vsub.f32 %v688_v60, %v783_v29 }
 0x302   : > { %v786_v34 = vpop.xlane.xlu0 %785 }
 0x303   : > { %v832_v35 = vpack.c.bf16 %v819_v33, %v818_v31  ;;  %v820_v38 = vsub.f32 %v1657_v56, %v786_v34 }
 0x304   : > { %v789_v36 = vpop.xlane.xlu1 %788 }
 0x305   : > { %v845_v37 = vmul.bf16 1069105081, %v832_v35  ;;  %v821_v39 = vsub.f32 %v1658_v58, %v789_v36 }
 0x307   : > { %1910 = vpow.bf16 %v845_v37  ;;  %v833_v40 = vpack.c.bf16 %v821_v39, %v820_v38 }
 0x309   : > { %v848_v42 = vmul.bf16 1069105081, %v833_v40 }
 0x30b   : > { %v1907_v43 = vpop.eup %1906  ;;  %1912 = vpow.bf16 %v848_v42 }
 0x30c   : > { %v1909_v44 = vpop.eup %1908  ;;  %v864_v49 = vunpack.c.l.bf16 %v1907_v43  ;;  %v865_v50 = vunpack.c.h.bf16 %v1907_v43 }
 0x30d   : > { %1683 = vmatprep.mubr.msk.bf16.mxu1 %vm765_vm0, %v1909_v44  ;;  %v862_v45 = vunpack.c.l.bf16 %v1909_v44  ;;  %v863_v46 = vunpack.c.h.bf16 %v1909_v44  ;;  %v1899_v44 = vld [vmem:[#allocation7 + $0x8] sm:$0xff]  }
 0x30e   : > { %1684 = vmatmul.mubr.msk.bf16.vlgmr.msra.gmra.mrb[8].mxu1 %vm765_vm0, %v1907_v43  ;;  %v884_v32 = vsel %vm765_vm0, %v864_v49, 0.0  ;;  %v887_v52 = vsel %vm765_vm0, %v865_v50, 0.0  ;;  %v1898_v43 = vld [vmem:[#allocation7] sm:$0xff]   ;;  %v1904_v49 = vld [vmem:[#allocation7 + $0x30] sm:$0xff]   ;;  %v1905_v50 = vld [vmem:[#allocation7 + $0x38] sm:$0xff]  }
 0x30f   : > { %v878_v47 = vsel %vm765_vm0, %v862_v45, 0.0  ;;  %v881_v48 = vsel %vm765_vm0, %v863_v46, 0.0  ;;  %1707 = vmatprep.subr.bf16.mxu1 %v1898_v43  ;;  %v1900_v45 = vld [vmem:[#allocation7 + $0x10] sm:$0xff]   ;;  %v1901_v46 = vld [vmem:[#allocation7 + $0x18] sm:$0xff]  }
 0x310   : > { %879 = vadd.xlane.f32.xlu0 %v878_v47  ;;  %882 = vadd.xlane.f32.xlu1 %v881_v48  ;;  %v1902_v47 = vld [vmem:[#allocation7 + $0x20] sm:$0xff]   ;;  %v1903_v48 = vld [vmem:[#allocation7 + $0x28] sm:$0xff]  }
 0x311   : > { %1708 = vmatpush3.bf16.msra.mxu1 %v1898_v43 }
 0x312   : > { %v1911_v30 = vpop.eup %1910  ;;  %1709 = vmatprep.subr.bf16.mxu1 %v1899_v44 }
 0x313   : > { %1687 = vmatprep.mubr.msk.bf16.mxu1 %vm765_vm0, %v1911_v30  ;;  %v867_v41 = vunpack.c.h.bf16 %v1911_v30  ;;  %v866_v53 = vunpack.c.l.bf16 %v1911_v30 }
 0x314   : > { %885 = vadd.xlane.f32.xlu0 %v884_v32  ;;  %888 = vadd.xlane.f32.xlu1 %v887_v52 }
 0x315   : > { %v893_v55 = vsel %vm765_vm0, %v867_v41, 0.0  ;;  %v890_v56 = vsel %vm765_vm0, %v866_v53, 0.0  ;;  %1710 = vmatpush3.bf16.msra.mxu1 %v1899_v44 }
 0x316   : > { %v1913_v51 = vpop.eup %1912  ;;  %v792_v54 = vpop.xlane.xlu0 %791  ;;  %1711 = vmatprep.subr.bf16.mxu1 %v1900_v45 }
 0x317   : > { %1688 = vmatmul.mubr.msk.bf16.gmra.mrb[12].mxu1 %vm765_vm0, %v1913_v51  ;;  %v869_v57 = vunpack.c.h.bf16 %v1913_v51  ;;  %v868_v58 = vunpack.c.l.bf16 %v1913_v51  ;;  %v822_v60 = vsub.f32 %v2400_v1, %v792_v54 }
 0x318   : > { %894 = vadd.xlane.f32.xlu1 %v893_v55  ;;  %891 = vadd.xlane.f32.xlu0 %v890_v56  ;;  %v795_v59 = vpop.xlane.xlu1 %794 }
 0x319   : > { %v823_v61 = vsub.f32 %v2406_v4, %v795_v59  ;;  %v899_v3 = vsel %vm765_vm0, %v869_v57, 0.0  ;;  %v896_v5 = vsel %vm765_vm0, %v868_v58, 0.0  ;;  %1712 = vmatpush3.bf16.msra.mxu1 %v1900_v45 }
 0x31a   : > { %v798_v62 = vpop.xlane.xlu0 %797  ;;  %1713 = vmatprep.subr.bf16.mxu1 %v1901_v46 }
 0x31b   : > { %v834_v63 = vpack.c.bf16 %v823_v61, %v822_v60  ;;  %v824_v11 = vsub.f32 %v2398_v0, %v798_v62 }
 0x31c   : > { %900 = vadd.xlane.f32.xlu1 %v899_v3  ;;  %897 = vadd.xlane.f32.xlu0 %v896_v5  ;;  %v801_v6 = vpop.xlane.xlu1 %800 }
 0x31d   : > { %v851_v8 = vmul.bf16 1069105081, %v834_v63  ;;  %v825_v13 = vsub.f32 %v2402_v2, %v801_v6  ;;  %1714 = vmatpush3.bf16.msra.mxu1 %v1901_v46 }
 0x31e   : > { %v804_v14 = vpop.xlane.xlu0 %803  ;;  %1715 = vmatprep.subr.bf16.mxu1 %v1902_v47 }
 0x31f   : > { %1914 = vpow.bf16 %v851_v8  ;;  %v835_v15 = vpack.c.bf16 %v825_v13, %v824_v11  ;;  %v826_v4 = vsub.f32 %v2416_v9, %v804_v14 }
 0x320   : > { %v807_v1 = vpop.xlane.xlu1 %806 }
 0x321   : > { %v854_v16 = vmul.bf16 1069105081, %v835_v15  ;;  %v827_v17 = vsub.f32 %v2422_v12, %v807_v1  ;;  %1716 = vmatpush3.bf16.msra.mxu1 %v1902_v47 }
 0x322   : > { %v810_v18 = vpop.xlane.xlu0 %809  ;;  %1717 = vmatprep.subr.bf16.mxu1 %v1903_v48 }
 0x323   : > { %1916 = vpow.bf16 %v854_v16  ;;  %v836_v19 = vpack.c.bf16 %v827_v17, %v826_v4  ;;  %v828_v22 = vsub.f32 %v2412_v7, %v810_v18 }
 0x324   : > { %v813_v20 = vpop.xlane.xlu1 %812 }
 0x325   : > { %v857_v21 = vmul.bf16 1069105081, %v836_v19  ;;  %v829_v0 = vsub.f32 %v2418_v10, %v813_v20  ;;  %1718 = vmatpush3.bf16.msra.mxu1 %v1903_v48 }
 0x326   : > { %1719 = vmatprep.subr.bf16.mxu1 %v1904_v49 }
 0x327   : > { %1918 = vpow.bf16 %v857_v21  ;;  %v837_v2 = vpack.c.bf16 %v829_v0, %v828_v22 }
 0x329   : > { %v860_v23 = vmul.bf16 1069105081, %v837_v2  ;;  %1720 = vmatpush3.bf16.msra.mxu1 %v1904_v49 }
 0x32a   : > { %v1915_v24 = vpop.eup %1914  ;;  %1721 = vmatprep.subr.bf16.mxu1 %v1905_v50 }
 0x32b   : > { %1920 = vpow.bf16 %v860_v23  ;;  %1699 = vmatprep.mubr.msk.bf16.mxu0 %vm765_vm0, %v1915_v24  ;;  %v871_v25 = vunpack.c.h.bf16 %v1915_v24  ;;  %v870_v9 = vunpack.c.l.bf16 %v1915_v24 }
 0x32d   : > { %v905_v12 = vsel %vm765_vm0, %v871_v25, 0.0  ;;  %v902_v26 = vsel %vm765_vm0, %v870_v9, 0.0  ;;  %1722 = vmatpush3.bf16.msra.mxu1 %v1905_v50 }
 0x32e   : > { %v1917_v27 = vpop.eup %1916  ;;  %906 = vadd.xlane.f32.xlu1 %v905_v12  ;;  %903 = vadd.xlane.f32.xlu0 %v902_v26 }
 0x32f   : > { %1700 = vmatmul.mubr.msk.bf16.vlgmr.msra.gmra.mrb[40].mxu0 %vm765_vm0, %v1917_v27  ;;  %v873_v7 = vunpack.c.h.bf16 %v1917_v27  ;;  %v872_v10 = vunpack.c.l.bf16 %v1917_v27 }
 0x331   : > { %v911_v28 = vsel %vm765_vm0, %v873_v7, 0.0  ;;  %v908_v29 = vsel %vm765_vm0, %v872_v10, 0.0 }
 0x332   : > { %v1919_v31 = vpop.eup %1918  ;;  %912 = vadd.xlane.f32.xlu1 %v911_v28  ;;  %909 = vadd.xlane.f32.xlu0 %v908_v29 }
 0x333   : > { %1703 = vmatprep.mubr.msk.bf16.mxu0 %vm765_vm0, %v1919_v31  ;;  %v875_v33 = vunpack.c.h.bf16 %v1919_v31  ;;  %v874_v34 = vunpack.c.l.bf16 %v1919_v31 }
 0x335   : > { %v917_v35 = vsel %vm765_vm0, %v875_v33, 0.0  ;;  %v914_v36 = vsel %vm765_vm0, %v874_v34, 0.0 }
 0x336   : > { %v1921_v37 = vpop.eup %1920  ;;  %918 = vadd.xlane.f32.xlu1 %v917_v35  ;;  %915 = vadd.xlane.f32.xlu0 %v914_v36 }
 0x337   : > { %1704 = vmatmul.mubr.msk.bf16.gmra.mrb[44].mxu0 %vm765_vm0, %v1921_v37  ;;  %v877_v38 = vunpack.c.h.bf16 %v1921_v37  ;;  %v876_v39 = vunpack.c.l.bf16 %v1921_v37 }
 0x339   : > { %v923_v40 = vsel %vm765_vm0, %v877_v38, 0.0  ;;  %v920_v42 = vsel %vm765_vm0, %v876_v39, 0.0 }
 0x33a   : > { %924 = vadd.xlane.f32.xlu1 %v923_v40  ;;  %921 = vadd.xlane.f32.xlu0 %v920_v42 }
 0x39d   : > { %v880_v30 = vpop.xlane.xlu0 %879  ;;  %v883_v32 = vpop.xlane.xlu1 %882 }
 0x39e   : > { %1922 = vrcp.f32 %v880_v30 }
 0x3a1   : > { %v886_v52 = vpop.xlane.xlu0 %885  ;;  %v889_v41 = vpop.xlane.xlu1 %888 }
 0x3a2   : > { %1924 = vrcp.f32 %v886_v52 }
 0x3a3   : > { %1926 = vrcp.f32 %v889_v41 }
 0x3a4   : > { %1928 = vrcp.f32 %v883_v32 }
 0x3a5   : > { %v892_v53 = vpop.xlane.xlu0 %891  ;;  %v895_v51 = vpop.xlane.xlu1 %894 }
 0x3a6   : > { %1930 = vrcp.f32 %v892_v53 }
 0x3a8   : > { %v1923_v56 = vpop.eup %1922 }
 0x3a9   : > { %v898_v54 = vpop.xlane.xlu0 %897  ;;  %v901_v55 = vpop.xlane.xlu1 %900 }
 0x3aa   : > { %1932 = vrcp.f32 %v898_v54 }
 0x3ab   : > { %1934 = vrcp.f32 %v901_v55 }
 0x3ac   : > { %v1925_v58 = vpop.eup %1924  ;;  %1936 = vrcp.f32 %v895_v51 }
 0x3ad   : > { %v1927_v60 = vpop.eup %1926 }
 0x3ae   : > { %v1929_v62 = vpop.eup %1928 }
 0x3b0   : > { %v1931_v14 = vpop.eup %1930 }
 0x3b4   : > { %v1933_v1 = vpop.eup %1932 }
 0x3b5   : > { %v1935_v4 = vpop.eup %1934 }
 0x3b6   : > { %v1937_v19 = vpop.eup %1936 }
 0x3bb   : > { %v904_v17 = vpop.xlane.xlu0 %903  ;;  %v907_v20 = vpop.xlane.xlu1 %906 }
 0x3bc   : > { %1938 = vrcp.f32 %v904_v17 }
 0x3bf   : > { %v910_v9 = vpop.xlane.xlu0 %909  ;;  %v913_v12 = vpop.xlane.xlu1 %912 }
 0x3c0   : > { %1940 = vrcp.f32 %v910_v9 }
 0x3c1   : > { %1942 = vrcp.f32 %v913_v12 }
 0x3c2   : > { %1944 = vrcp.f32 %v907_v20 }
 0x3c3   : > { %v916_v26 = vpop.xlane.xlu0 %915  ;;  %v919_v27 = vpop.xlane.xlu1 %918 }
 0x3c4   : > { %1946 = vrcp.f32 %v916_v26 }
 0x3c6   : > { %v1939_v28 = vpop.eup %1938 }
 0x3c7   : > { %v922_v7 = vpop.xlane.xlu0 %921  ;;  %v925_v10 = vpop.xlane.xlu1 %924 }
 0x3c8   : > { %1948 = vrcp.f32 %v922_v7 }
 0x3c9   : > { %1950 = vrcp.f32 %v925_v10 }
 0x3ca   : > { %v1941_v31 = vpop.eup %1940  ;;  %1952 = vrcp.f32 %v919_v27 }
 0x3cb   : > { %v1943_v34 = vpop.eup %1942 }
 0x3cc   : > { %v1945_v36 = vpop.eup %1944 }
 0x3ce   : > { %v1947_v45 = vpop.eup %1946 }
 0x3d2   : > { %v1949_v47 = vpop.eup %1948 }
 0x3d3   : > { %v1951_v49 = vpop.eup %1950 }
 0x3d4   : > { %v1953_v30 = vpop.eup %1952 }
 0x3e1   : > { %v1685_v57 = vpop.f32.mrb[8].mxu1 }
 0x3e2   : > { %v972_v59 = vpop.f32.mrb[9].mxu1  ;;  %v1098_v63 = vmul.f32 %v1925_v58, %v1685_v57  ;;  %v1531_v57 = vld [vmem:[%s2530_s4] ss:$0 sm:$0xff] }
 0x3e3   : > { %v1686_v61 = vpop.f32.mrb[10].mxu1  ;;  %v1096_v6 = vmul.f32 %v1923_v56, %v972_v59 }
 0x3e4   : > { %v1099_v3 = vmul.f32 %v1927_v60, %v1686_v61  ;;  %v975_v5 = vpop.f32.mrb[11].mxu1 }
 0x3e5   : > { %v1097_v8 = vmul.f32 %v1929_v62, %v975_v5 }
 0x3e6   : > { %v1113_v11 = vpack.c.bf16 %v1099_v3, %v1098_v63 }
 0x3e7   : > { %v1112_v13 = vpack.c.bf16 %v1097_v8, %v1096_v6 }
 0x3e9   : > { %1723 = vmatprep.mubr.bf16.mxu1 %v1112_v13 }
 0x3ea   : > { %v1689_v15 = vpop.f32.mrb[12].mxu1  ;;  %1724 = vmatmul.mubr.bf16.vlgmr.msra.gmra.mrb[16].mxu1 %v1113_v11 }
 0x3eb   : > { %v988_v16 = vpop.f32.mrb[13].mxu1  ;;  %v1102_v21 = vmul.f32 %v1933_v1, %v1689_v15 }
 0x3ec   : > { %v1690_v18 = vpop.f32.mrb[14].mxu1  ;;  %v1100_v2 = vmul.f32 %v1931_v14, %v988_v16 }
 0x3ed   : > { %v1103_v22 = vmul.f32 %v1935_v4, %v1690_v18  ;;  %v991_v0 = vpop.f32.mrb[15].mxu1 }
 0x3ee   : > { %v1101_v23 = vmul.f32 %v1937_v19, %v991_v0 }
 0x3ef   : > { %v1115_v24 = vpack.c.bf16 %v1103_v22, %v1102_v21 }
 0x3f0   : > { %v1114_v25 = vpack.c.bf16 %v1101_v23, %v1100_v2 }
 0x3f2   : > { %1727 = vmatprep.mubr.bf16.mxu1 %v1114_v25 }
 0x3f3   : > { %1728 = vmatmul.mubr.bf16.gmra.mrb[20].mxu1 %v1115_v24 }
 0x402   : > { %v1701_v29 = vpop.f32.mrb[40].mxu0 }
 0x403   : > { %v1049_v33 = vpop.f32.mrb[41].mxu0  ;;  %v1106_v37 = vmul.f32 %v1941_v31, %v1701_v29 }
 0x404   : > { %v1702_v35 = vpop.f32.mrb[42].mxu0  ;;  %v1104_v40 = vmul.f32 %v1939_v28, %v1049_v33 }
 0x405   : > { %v1107_v38 = vmul.f32 %v1943_v34, %v1702_v35  ;;  %v1052_v39 = vpop.f32.mrb[43].mxu0 }
 0x406   : > { %v1105_v42 = vmul.f32 %v1945_v36, %v1052_v39 }
 0x407   : > { %v1117_v43 = vpack.c.bf16 %v1107_v38, %v1106_v37 }
 0x408   : > { %v1116_v44 = vpack.c.bf16 %v1105_v42, %v1104_v40 }
 0x40a   : > { %v1705_v46 = vpop.f32.mrb[44].mxu0  ;;  %1731 = vmatprep.mubr.bf16.mxu1 %v1116_v44 }
 0x40b   : > { %v1065_v48 = vpop.f32.mrb[45].mxu0  ;;  %1732 = vmatmul.mubr.bf16.gmra.mrb[24].mxu1 %v1117_v43  ;;  %v1110_v32 = vmul.f32 %v1949_v47, %v1705_v46 }
 0x40c   : > { %v1706_v50 = vpop.f32.mrb[46].mxu0  ;;  %v1108_v53 = vmul.f32 %v1947_v45, %v1065_v48 }
 0x40d   : > { %v1111_v52 = vmul.f32 %v1951_v49, %v1706_v50  ;;  %v1068_v41 = vpop.f32.mrb[47].mxu0 }
 0x40e   : > { %v1109_v51 = vmul.f32 %v1953_v30, %v1068_v41 }
 0x40f   : > { %v1119_v54 = vpack.c.bf16 %v1111_v52, %v1110_v32 }
 0x410   : > { %v1118_v55 = vpack.c.bf16 %v1109_v51, %v1108_v53 }
 0x412   : > { %1735 = vmatprep.mubr.bf16.mxu1 %v1118_v55 }
 0x413   : > { %1736 = vmatmul.mubr.bf16.gmra.mrb[28].mxu1 %v1119_v54 }
 0x4bd   : > { %v1725_v56 = vpop.f32.mrb[16].mxu1 }
 0x4be   : > { %v1225_v58 = vpop.f32.mrb[17].mxu1  ;;  %v1234_v60 = vadd.f32 %v1725_v56, %v1531_v57 }
 0x4bf   : > { %v1726_v59 = vpop.f32.mrb[18].mxu1  ;;  %v1226_v63 = vadd.f32 %v1531_v57, %v1225_v58 }
 0x4c0   : > { %v1237_v61 = vadd.f32 %v1726_v59, %v1531_v57  ;;  %v1228_v62 = vpop.f32.mrb[19].mxu1 }
 0x4c1   : > { %v1229_v3 = vadd.f32 %v1531_v57, %v1228_v62 }
 0x4c2   : > { %v1556_v5 = vpack.c.bf16 %v1237_v61, %v1234_v60 }
 0x4c3   : > { %v1551_v6 = vpack.c.bf16 %v1229_v3, %v1226_v63 }
 0x4c4   : > { %1588 = vst [vmem:[%s2467_s6 + $0x8] sm:$0xff] %v1556_v5  }
 0x4c5   : > { %1552 = vst [vmem:[%s2467_s6] sm:$0xff] %v1551_v6  }
 0x4c6   : > { %v1729_v8 = vpop.f32.mrb[20].mxu1 }
 0x4c7   : > { %v1241_v11 = vpop.f32.mrb[21].mxu1  ;;  %v1250_v14 = vadd.f32 %v1729_v8, %v1531_v57 }
 0x4c8   : > { %v1730_v13 = vpop.f32.mrb[22].mxu1  ;;  %v1242_v16 = vadd.f32 %v1531_v57, %v1241_v11 }
 0x4c9   : > { %v1253_v15 = vadd.f32 %v1730_v13, %v1531_v57  ;;  %v1244_v1 = vpop.f32.mrb[23].mxu1 }
 0x4ca   : > { %v1245_v4 = vadd.f32 %v1531_v57, %v1244_v1 }
 0x4cb   : > { %v1566_v17 = vpack.c.bf16 %v1253_v15, %v1250_v14 }
 0x4cc   : > { %v1561_v18 = vpack.c.bf16 %v1245_v4, %v1242_v16 }
 0x4cd   : > { %1590 = vst [vmem:[%s2467_s6 + $0x18] sm:$0xff] %v1566_v17  }
 0x4ce   : > { %1589 = vst [vmem:[%s2467_s6 + $0x10] sm:$0xff] %v1561_v18  }
 0x4de   : > { %v1733_v19 = vpop.f32.mrb[24].mxu1 }
 0x4df   : > { %v1257_v20 = vpop.f32.mrb[25].mxu1  ;;  %v1266_v22 = vadd.f32 %v1733_v19, %v1531_v57 }
 0x4e0   : > { %v1734_v21 = vpop.f32.mrb[26].mxu1  ;;  %v1258_v23 = vadd.f32 %v1531_v57, %v1257_v20 }
 0x4e1   : > { %v1269_v0 = vadd.f32 %v1734_v21, %v1531_v57  ;;  %v1260_v2 = vpop.f32.mrb[27].mxu1 }
 0x4e2   : > { %v1261_v24 = vadd.f32 %v1531_v57, %v1260_v2 }
 0x4e3   : > { %v1576_v25 = vpack.c.bf16 %v1269_v0, %v1266_v22 }
 0x4e4   : > { %v1571_v9 = vpack.c.bf16 %v1261_v24, %v1258_v23 }
 0x4e5   : > { %1592 = vst [vmem:[%s2467_s6 + $0x28] sm:$0xff] %v1576_v25  }
 0x4e6   : > { %1591 = vst [vmem:[%s2467_s6 + $0x20] sm:$0xff] %v1571_v9   ;;  %v1737_v12 = vpop.f32.mrb[28].mxu1 }
 0x4e7   : > { %v1273_v26 = vpop.f32.mrb[29].mxu1  ;;  %v1282_v7 = vadd.f32 %v1737_v12, %v1531_v57 }
 0x4e8   : > { %v1738_v27 = vpop.f32.mrb[30].mxu1  ;;  %v1274_v29 = vadd.f32 %v1531_v57, %v1273_v26 }
 0x4e9   : > { %v1285_v10 = vadd.f32 %v1738_v27, %v1531_v57  ;;  %v1276_v28 = vpop.f32.mrb[31].mxu1 }
 0x4ea   : > { %v1277_v31 = vadd.f32 %v1531_v57, %v1276_v28 }
 0x4eb   : > { %v1586_v33 = vpack.c.bf16 %v1285_v10, %v1282_v7 }
 0x4ec   : > { %v1581_v34 = vpack.c.bf16 %v1277_v31, %v1274_v29 }
 0x4ed   : > { %1594 = vst [vmem:[%s2467_s6 + $0x38] sm:$0xff] %v1586_v33  }
 0x4ee   : > { %1593 = vst [vmem:[%s2467_s6 + $0x30] sm:$0xff] %v1581_v34  }
 0x4ef   : > { %s1547_s17 = sshll.u32 %s2072_s22, 4  ;;  %s1355_s14 = sshll.u32 %s2467_s6, 4  ;;  %s1356_s14 = int_to_ptr.vmem [resolvable:$true] %s1355_s14 }
 0x4f0   : > { %s1334_s11 = sadd.s32 %s2068_s21, %s1547_s17  ;;  %s2559_s27 = sld [smem:[#allocation22_spill]] }
 0x4f1   : > { %s1543_s26 = sshll.u32 %s1334_s11, 6  ;;  %s2100_s13 = smov 512  }
 0x4f2   : > { %p2560_p8 = scmp.ne.s32.totalorder %s2549_s10, 0  ;;  %s2101_s29 = smov 2048  }
 0x4f3   : > { %s2102_s28 = smov 8   ;;  %s2103_s22 = smov 64  }
 0x4f4   : > { %1756 = sst [smem:[#allocation12]] (%p2560_p8), %s2100_s13  ;;  %s2104_s21 = smov 128  }
 0x4f5   : > { %1757 = sst [smem:[#allocation12 + $0x1]] (%p2560_p8), %s2101_s29  ;;  %s2105_s18 = smov 4  }
 0x4f6   : > { %s1338_s5 = scalar_lea.hbm %s2559_s27, %s1543_s26  ;;  %1758 = sst [smem:[#allocation12 + $0x2]] (%p2560_p8), %s2102_s28 }
 0x4f7   : > { %1759 = sst [smem:[#allocation12 + $0x3]] (%p2560_p8), %s2103_s22  ;;  %s2106_s7 = smov [#allocation11]  }
 0x4f8   : > { %1760 = sst [smem:[#allocation12 + $0x4]] (%p2560_p8), %s2104_s21  ;;  %s2107_s8 = smov 0  }
 0x4f9   : > { %1761 = sst [smem:[#allocation12 + $0x5]] (%p2560_p8), %s2105_s18 }
 0x4fa   : > { %1762 = dma.general (%p2560_p8), %s1356_s14, 1024, %s1338_s5, %s1321_s16, %s2106_s7, [#allocation12], %s2107_s8, 0  }
 0x4fb PF: > { %s2561_s9 = sld [smem:[#allocation17_spill]]  ;;  %s2562_s15 = sld [smem:[#allocation20_spill]] }
 0x4fc   : > { %p1779_p9 = scmp.ge.s32.totalorder %s2084_s25, 2 }
 0x501   : > { %s1383_s6 = sand.u32 1, %s2561_s9   ;;  %p2563_p2 = scmp.ne.s32.totalorder %s2562_s15, 0 }
 0x502   : > { %s1384_s17 = scalar_lea.sflag [#allocation4], %s1383_s6 }
 0x503   : > { %p1772_p5 = pnand %p1779_p9, %p2563_p2 }
 0x505   : > { %2051 = dma.done.wait (!%p1772_p5), %s1384_s17, 1024  }
 0x506   : > { %2053 = vsyncadd (!%p1772_p5), %s1384_s17, 4294966272  ;;  %s22_s25 = sadd.s32 1, %s2084_s25   ;;  %s2564_s11 = sld [smem:[#allocation21_spill]] }
 0x507   : > { %p19_p10 = scmp.ge.s32.totalorder %s22_s25, 6   ;;  %s2565_s10 = sld [smem:[#allocation18_spill]] }
 0x508   : > { %s2566_s16 = sld [smem:[#allocation19_spill]]  ;;  %s2567_s18 = smov %s2060_s19 }
 0x509   : > { %s2568_s19 = smov %s2064_s20  ;;  %s2570_s21 = smov %s2076_s23 }
 0x50a   : > { %s2571_s22 = smov %s2080_s24  ;;  %21 = sbr.rel (!%p19_p10) target bundleno = 10 (0xa), region = 103 }
 0x50c   : > { %s2569_s20 = smov %s2564_s11 }
 0x50d   : > { %s2572_s23 = smov %s2565_s10 }
 0x50e   : > { %s2573_s24 = smov %s2566_s16 }
 0x511   :  { %1389 = vsyncpa [#allocation3], 1 }
 0x512   :  { %1391 = vsyncpa [#allocation3 + $0x1], 1 }
 0x513   :  { %1392 = vsyncpa [#allocation6], 1 }
 0x514   :  { %1393 = vsyncpa [#allocation4], 1 }
 0x515   :  { %1395 = vsyncpa [#allocation4 + $0x1], 1 }

</bundles_post_ra>
